<compile_context>
chip_gen: v6e
topology: v6e:2x2x1
jax: 0.10.0
libtpu: 0.0.40
codegen_flags: <defaults>
</compile_context>

<pallas_src>
import functools
import math

import jax
import jax.numpy as jnp
from jax import lax
from jax.experimental import pallas as pl
from jax.experimental.pallas import tpu as pltpu

ACT_DTYPE = jnp.bfloat16   # inter-call activations (encoder memory handed to decoder)
WGT_DTYPE = jnp.bfloat16   # matmul weights (native MXU dtype, halves weight DMA/VMEM)


@functools.lru_cache(maxsize=None)
def _vmem_limit_bytes():
    """Physical VMEM minus headroom, capped at 100 MiB (v5e/v6e), floor 32 MiB."""
    phys = 64 * 1024 * 1024
    try:
        info = pltpu.get_tpu_info()
        for attr in ("vmem_capacity_bytes", "vmem_size_bytes", "vmem_bytes"):
            v = getattr(info, attr, None)
            if v:
                phys = int(v)
                break
    except Exception:
        pass
    return max(32 * 1024 * 1024, min(phys - 8 * 1024 * 1024, 100 * 1024 * 1024))


def _compiler_params():
    # batch axis parallel (megacore sharding), layer axis arbitrary (carried VMEM state).
    return pltpu.CompilerParams(
        dimension_semantics=("parallel", "arbitrary"),
        vmem_limit_bytes=_vmem_limit_bytes())


# ---------------------------------------------------------------------------
# in-kernel helpers (operate on loaded values, not refs)
# ---------------------------------------------------------------------------

def _layer_norm(x, gamma, beta, eps=1e-5):
    """f32 LayerNorm over the last dim (matches nn.LayerNorm eps=1e-5)."""
    mu = jnp.mean(x, axis=-1, keepdims=True)
    var = jnp.mean((x - mu) ** 2, axis=-1, keepdims=True)
    return (x - mu) * lax.rsqrt(var + eps) * gamma + beta


def _attention_core(q, k, v, w_o, b_o, num_heads):
    """q (Sq,E) / k,v (Sk,E) f32 projections -> (Sq,E) f32 attention output.

    Head split is a reshape only (no explicit transpose); the 1/sqrt(Dh) scale is folded
    into q before the bf16 cast.
    """
    sq, e = q.shape
    sk = k.shape[0]
    h = num_heads
    dh = e // h
    scale = 1.0 / math.sqrt(dh)

    qh = (q * scale).astype(jnp.bfloat16).reshape(sq, h, dh)
    kh = k.astype(jnp.bfloat16).reshape(sk, h, dh)
    vh = v.astype(jnp.bfloat16).reshape(sk, h, dh)

    s = jnp.einsum("qhd,khd->hqk", qh, kh,
                   preferred_element_type=jnp.float32)            # (H, Sq, Sk) f32
    s = s - jnp.max(s, axis=-1, keepdims=True)
    p = jnp.exp(s)
    p = p * pl.reciprocal(jnp.sum(p, axis=-1, keepdims=True), approx=True)  # EUP

    ctx = jnp.einsum("hqk,khd->qhd", p.astype(jnp.bfloat16), vh,
                     preferred_element_type=jnp.float32)           # (Sq, H, Dh) f32
    attn = ctx.reshape(sq, e)
    return jnp.dot(attn.astype(jnp.bfloat16), w_o,
                   preferred_element_type=jnp.float32) + b_o


def _self_attn(x, w_qkv, b_qkv, w_o, b_o, num_heads):
    """Fused Q/K/V projection (one (S,E)x(E,3E) matmul) + attention."""
    e = x.shape[-1]
    qkv = jnp.dot(x.astype(jnp.bfloat16), w_qkv,
                  preferred_element_type=jnp.float32) + b_qkv      # (S, 3E) f32
    return _attention_core(qkv[:, :e], qkv[:, e:2 * e], qkv[:, 2 * e:],
                           w_o, b_o, num_heads)


def _cross_attn(x, mem, w_qkv, b_qkv, w_o, b_o, num_heads):
    """Query from x, K/V from encoder memory (nn.MultiheadAttention in_proj layout)."""
    e = x.shape[-1]
    q = jnp.dot(x.astype(jnp.bfloat16), w_qkv[:, :e],
                preferred_element_type=jnp.float32) + b_qkv[:, :e]
    kv = jnp.dot(mem.astype(jnp.bfloat16), w_qkv[:, e:],
                 preferred_element_type=jnp.float32) + b_qkv[:, e:]
    return _attention_core(q, kv[:, :e], kv[:, e:], w_o, b_o, num_heads)


def _ffn(x, w1, b1, w2, b2):
    h = jnp.dot(x.astype(jnp.bfloat16), w1, preferred_element_type=jnp.float32) + b1
    h = jnp.maximum(h, 0.0)                                        # ReLU (PyTorch default)
    return jnp.dot(h.astype(jnp.bfloat16), w2, preferred_element_type=jnp.float32) + b2


# ---------------------------------------------------------------------------
# kernels
# ---------------------------------------------------------------------------

def encoder_stack_kernel(patches_ref, wp_ref, bp_ref, pos_ref,
                         wqkv_ref, bqkv_ref, wo_ref, bo_ref,
                         g1_ref, be1_ref, w1_ref, b1_ref, w2_ref, b2_ref,
                         g2_ref, be2_ref,
                         o_ref, x_scr, *, num_heads):
    """Grid (B, L_enc). Patch-embed fused at l==0; activation carried in x_scr (f32)."""
    l = pl.program_id(1)

    @pl.when(l == 0)
    def _():
        # Conv2d(kernel=P, stride=P) == per-patch Linear; pos_embed add fused in.
        y = jnp.dot(patches_ref[...], wp_ref[...], preferred_element_type=jnp.float32)
        x_scr[...] = y + bp_ref[...] + pos_ref[...]

    x = x_scr[...]                                                 # (S, E) f32
    attn = _self_attn(x, wqkv_ref[...], bqkv_ref[...], wo_ref[...], bo_ref[...],
                      num_heads)
    x1 = _layer_norm(x + attn, g1_ref[...], be1_ref[...])          # post-norm
    ff = _ffn(x1, w1_ref[...], b1_ref[...], w2_ref[...], b2_ref[...])
    x2 = _layer_norm(x1 + ff, g2_ref[...], be2_ref[...])
    x_scr[...] = x2

    @pl.when(l == pl.num_programs(1) - 1)
    def _():
        o_ref[...] = x2.astype(o_ref.dtype)


def decoder_stack_kernel(pos_ref, mem_ref,
                         wsa_ref, bsa_ref, wosa_ref, bosa_ref, g1_ref, be1_ref,
                         wca_ref, bca_ref, woca_ref, boca_ref, g2_ref, be2_ref,
                         w1_ref, b1_ref, w2_ref, b2_ref, g3_ref, be3_ref,
                         wh_ref, bh_ref,
                         o_ref, x_scr, *, num_heads):
    """Grid (B, L_dec). Query init (pos_embed) at l==0; reconstruction head fused at the
    last layer; activation carried in x_scr (f32)."""
    l = pl.program_id(1)

    @pl.when(l == 0)
    def _():
        x_scr[...] = pos_ref[...]                                  # decoder query

    x = x_scr[...]                                                 # (S, E) f32
    mem = mem_ref[...]                                             # (S_m, E) bf16

    sa = _self_attn(x, wsa_ref[...], bsa_ref[...], wosa_ref[...], bosa_ref[...],
                    num_heads)
    x1 = _layer_norm(x + sa, g1_ref[...], be1_ref[...])

    ca = _cross_attn(x1, mem, wca_ref[...], bca_ref[...], woca_ref[...], boca_ref[...],
                     num_heads)
    x2 = _layer_norm(x1 + ca, g2_ref[...], be2_ref[...])

    ff = _ffn(x2, w1_ref[...], b1_ref[...], w2_ref[...], b2_ref[...])
    x3 = _layer_norm(x2 + ff, g3_ref[...], be3_ref[...])
    x_scr[...] = x3

    @pl.when(l == pl.num_programs(1) - 1)
    def _():
        h = jnp.dot(x3.astype(jnp.bfloat16), wh_ref[...],
                    preferred_element_type=jnp.float32) + bh_ref[...]
        # TODO(synk): tanh-approx GELU in-kernel; PyTorch nn.GELU() default is exact erf
        # (max abs difference ~3e-4, well inside the test tolerance).
        c = math.sqrt(2.0 / math.pi)
        g = 0.5 * h * (1.0 + jnp.tanh(c * (h + 0.044715 * h * h * h)))
        # TODO(synk): output last dim P*P*C is not a multiple of 128 -> masked stores;
        # lane-dense folding would need a tile-crossing in-kernel reshape.
        o_ref[...] = g.astype(o_ref.dtype)


# ---------------------------------------------------------------------------
# pallas_call wrappers
# ---------------------------------------------------------------------------

def _stacked_spec(arr):
    """BlockSpec for per-layer weights stacked along a leading L axis."""
    nd = arr.ndim
    return pl.BlockSpec((None,) + arr.shape[1:],
                        lambda b, l, _nd=nd: (l,) + (0,) * (_nd - 1))


def _const_spec(arr):
    """BlockSpec for grid-invariant weights (block index never changes -> no re-DMA)."""
    nd = arr.ndim
    return pl.BlockSpec(arr.shape, lambda b, l, _nd=nd: (0,) * _nd)


_ENC_KEYS = ("wqkv_t", "bqkv", "wo_t", "bo", "g1", "be1",
             "w1_t", "b1", "w2_t", "b2", "g2", "be2")
_DEC_KEYS = ("wsa_t", "bsa", "wosa_t", "bosa", "g1", "be1",
             "wca_t", "bca", "woca_t", "boca", "g2", "be2",
             "w1_t", "b1", "w2_t", "b2", "g3", "be3")


def encoder_stack(patches, pos_embed, p_patch, p_enc, num_heads):
    B, N, D = patches.shape
    E = p_patch["w_t"].shape[1]
    L = p_enc["wqkv_t"].shape[0]
    weights = [p_enc[k] for k in _ENC_KEYS]

    in_specs = ([pl.BlockSpec((None, N, D), lambda b, l: (b, 0, 0)),
                 _const_spec(p_patch["w_t"]),
                 _const_spec(p_patch["b"]),
                 pl.BlockSpec((None, N, E), lambda b, l: (0, 0, 0))]
                + [_stacked_spec(w) for w in weights])

    return pl.pallas_call(
        functools.partial(encoder_stack_kernel, num_heads=num_heads),
        out_shape=jax.ShapeDtypeStruct((B, N, E), ACT_DTYPE),
        grid_spec=pltpu.PrefetchScalarGridSpec(
            num_scalar_prefetch=0,
            grid=(B, L),
            in_specs=in_specs,
            out_specs=pl.BlockSpec((None, N, E), lambda b, l: (b, 0, 0)),
            scratch_shapes=[pltpu.VMEM((N, E), jnp.float32)]),
        compiler_params=_compiler_params(),
    )(patches, p_patch["w_t"], p_patch["b"], pos_embed, *weights)


def decoder_stack(memory, pos_embed, p_dec, p_head, num_heads):
    B, N, E = memory.shape
    L = p_dec["wsa_t"].shape[0]
    Pout = p_head["w_t"].shape[1]
    weights = [p_dec[k] for k in _DEC_KEYS]

    in_specs = ([pl.BlockSpec((None, N, E), lambda b, l: (0, 0, 0)),   # pos_embed (query)
                 pl.BlockSpec((None, N, E), lambda b, l: (b, 0, 0))]   # encoder memory
                + [_stacked_spec(w) for w in weights]
                + [_const_spec(p_head["w_t"]), _const_spec(p_head["b"])])

    return pl.pallas_call(
        functools.partial(decoder_stack_kernel, num_heads=num_heads),
        out_shape=jax.ShapeDtypeStruct((B, N, Pout), jnp.float32),
        grid_spec=pltpu.PrefetchScalarGridSpec(
            num_scalar_prefetch=0,
            grid=(B, L),
            in_specs=in_specs,
            out_specs=pl.BlockSpec((None, N, Pout), lambda b, l: (b, 0, 0)),
            scratch_shapes=[pltpu.VMEM((N, E), jnp.float32)]),
        compiler_params=_compiler_params(),
    )(pos_embed, memory, *weights, p_head["w_t"], p_head["b"])


# ---------------------------------------------------------------------------
# layout-only ops (pure transposes, done in the JAX wrapper)
# ---------------------------------------------------------------------------

def extract_patches(x, patch_size):
    """(B,C,H,W) -> (B, N, C*P*P); feature order (C,P,P) matches the flattened
    Conv2d(kernel=P, stride=P) weight, and flatten(2).transpose(1,2) patch order."""
    B, C, H, W = x.shape
    P = patch_size
    h, w = H // P, W // P
    x = x.reshape(B, C, h, P, w, P)
    x = x.transpose(0, 2, 4, 1, 3, 5)         # (B, h, w, C, P, P)
    return x.reshape(B, h * w, C * P * P)


def unpatchify(x, patch_size, in_channels):
    """(B, N, P*P*C) -> (B, C, H, W); mirrors ViTAutoencoder.unpatchify."""
    B, N, _ = x.shape
    h = w = int(round(math.sqrt(N)))
    p = patch_size
    c = in_channels
    x = x.reshape(B, h, w, p, p, c)
    x = jnp.einsum("nhwpqc->nchpwq", x)
    return x.reshape(B, c, h * p, w * p)


# ---------------------------------------------------------------------------
# full forward: exactly two pallas_calls
# ---------------------------------------------------------------------------

def vit_autoencoder_forward(x_img, params, *, num_heads, patch_size, in_channels):
    # TODO(synk): for very long sequences (S*S f32 scores exceeding VMEM) a q-tiled
    # variant with a cached K/V scratch would be needed; standard ViT S (<=1024) fits.
    patches = extract_patches(x_img, patch_size).astype(ACT_DTYPE)
    memory = encoder_stack(patches, params["pos_embed"], params["patch"],
                           params["encoder"], num_heads)
    patches_out = decoder_stack(memory, params["pos_embed"], params["decoder"],
                                params["head"], num_heads)
    return unpatchify(patches_out, patch_size, in_channels)


# ---------------------------------------------------------------------------
# parameters (per-layer weights stacked along a leading L axis)
# ---------------------------------------------------------------------------

def init_params(key, *, img_size, patch_size, in_channels, embed_dim,
                encoder_depth, decoder_depth, mlp_ratio):
    E = embed_dim
    F = int(E * mlp_ratio)
    P = patch_size
    C = in_channels
    N = (img_size // P) ** 2
    D = C * P * P
    Le, Ld = encoder_depth, decoder_depth
    scale = 0.02

    kit = iter(jax.random.split(key, 64))

    def nk():
        return next(kit)

    def nrm(shape):
        return jax.random.normal(nk(), shape, jnp.float32) * scale

    def wgt(shape):
        return nrm(shape).astype(WGT_DTYPE)

    return {
        # weights pre-transposed to (in_dim, out_dim) so kernels do x @ W_t + b.
        "patch": {"w_t": wgt((D, E)), "b": nrm((1, E))},
        # TODO(synk): PyTorch initialises pos_embed to zeros; small random values are used
        # so the decoder-query path is exercised (it is a learnable parameter either way).
        "pos_embed": nrm((1, N, E)),
        "head": {"w_t": wgt((E, D)), "b": nrm((1, D))},
        "encoder": {
            "wqkv_t": wgt((Le, E, 3 * E)), "bqkv": nrm((Le, 1, 3 * E)),
            "wo_t": wgt((Le, E, E)),       "bo": nrm((Le, 1, E)),
            "g1": 1.0 + nrm((Le, 1, E)),   "be1": nrm((Le, 1, E)),
            "w1_t": wgt((Le, E, F)),       "b1": nrm((Le, 1, F)),
            "w2_t": wgt((Le, F, E)),       "b2": nrm((Le, 1, E)),
            "g2": 1.0 + nrm((Le, 1, E)),   "be2": nrm((Le, 1, E)),
        },
        "decoder": {
            "wsa_t": wgt((Ld, E, 3 * E)),  "bsa": nrm((Ld, 1, 3 * E)),
            "wosa_t": wgt((Ld, E, E)),     "bosa": nrm((Ld, 1, E)),
            "g1": 1.0 + nrm((Ld, 1, E)),   "be1": nrm((Ld, 1, E)),
            "wca_t": wgt((Ld, E, 3 * E)),  "bca": nrm((Ld, 1, 3 * E)),
            "woca_t": wgt((Ld, E, E)),     "boca": nrm((Ld, 1, E)),
            "g2": 1.0 + nrm((Ld, 1, E)),   "be2": nrm((Ld, 1, E)),
            "w1_t": wgt((Ld, E, F)),       "b1": nrm((Ld, 1, F)),
            "w2_t": wgt((Ld, F, E)),       "b2": nrm((Ld, 1, E)),
            "g3": 1.0 + nrm((Ld, 1, E)),   "be3": nrm((Ld, 1, E)),
        },
    }


# ---------------------------------------------------------------------------
# pure-JAX f32 reference (PyTorch eval-mode semantics)
# ---------------------------------------------------------------------------

def _ref_layer_norm(x, g, b, eps=1e-5):
    mu = jnp.mean(x, axis=-1, keepdims=True)
    var = jnp.mean((x - mu) ** 2, axis=-1, keepdims=True)
    return (x - mu) * lax.rsqrt(var + eps) * g + b


def _ref_mha(q_in, kv_in, w_qkv, b_qkv, w_o, b_o, num_heads):
    B, Sq, E = q_in.shape
    Sk = kv_in.shape[1]
    H = num_heads
    Dh = E // H
    q = q_in @ w_qkv[:, :E] + b_qkv[:, :E]
    k = kv_in @ w_qkv[:, E:2 * E] + b_qkv[:, E:2 * E]
    v = kv_in @ w_qkv[:, 2 * E:] + b_qkv[:, 2 * E:]

    def split(t, S):
        return t.reshape(B, S, H, Dh).transpose(0, 2, 1, 3)

    qh, kh, vh = split(q, Sq), split(k, Sk), split(v, Sk)
    s = jnp.einsum("bhqd,bhkd->bhqk", qh, kh) / math.sqrt(Dh)
    a = jax.nn.softmax(s, axis=-1)
    o = jnp.einsum("bhqk,bhkd->bhqd", a, vh).transpose(0, 2, 1, 3).reshape(B, Sq, E)
    return o @ w_o + b_o


def reference_forward(x_img, params, num_heads, patch_size, in_channels):
    pf = jax.tree_util.tree_map(lambda a: a.astype(jnp.float32), params)
    patches = extract_patches(x_img.astype(jnp.float32), patch_size)
    x = patches @ pf["patch"]["w_t"] + pf["patch"]["b"] + pf["pos_embed"]

    enc = pf["encoder"]
    for i in range(enc["wqkv_t"].shape[0]):
        attn = _ref_mha(x, x, enc["wqkv_t"][i], enc["bqkv"][i],
                        enc["wo_t"][i], enc["bo"][i], num_heads)
        x1 = _ref_layer_norm(x + attn, enc["g1"][i], enc["be1"][i])
        ff = jnp.maximum(x1 @ enc["w1_t"][i] + enc["b1"][i], 0.0) @ enc["w2_t"][i] + enc["b2"][i]
        x = _ref_layer_norm(x1 + ff, enc["g2"][i], enc["be2"][i])
    memory = x

    B = x_img.shape[0]
    y = jnp.broadcast_to(pf["pos_embed"], (B,) + pf["pos_embed"].shape[1:])
    dec = pf["decoder"]
    for i in range(dec["wsa_t"].shape[0]):
        sa = _ref_mha(y, y, dec["wsa_t"][i], dec["bsa"][i],
                      dec["wosa_t"][i], dec["bosa"][i], num_heads)
        y1 = _ref_layer_norm(y + sa, dec["g1"][i], dec["be1"][i])
        ca = _ref_mha(y1, memory, dec["wca_t"][i], dec["bca"][i],
                      dec["woca_t"][i], dec["boca"][i], num_heads)
        y2 = _ref_layer_norm(y1 + ca, dec["g2"][i], dec["be2"][i])
        ff = jnp.maximum(y2 @ dec["w1_t"][i] + dec["b1"][i], 0.0) @ dec["w2_t"][i] + dec["b2"][i]
        y = _ref_layer_norm(y2 + ff, dec["g3"][i], dec["be3"][i])

    h = y @ pf["head"]["w_t"] + pf["head"]["b"]
    patches_out = jax.nn.gelu(h, approximate=False)      # exact erf GELU (PyTorch default)
    return unpatchify(patches_out, patch_size, in_channels)


if __name__ == "__main__":
    # Small shapes consistent with the module (scaled-down ViT).
    batch = 2
    img_size, patch_size, in_channels = 16, 4, 3
    embed_dim, num_heads, mlp_ratio = 32, 4, 4.0
    encoder_depth, decoder_depth = 2, 2

    key = jax.random.PRNGKey(0)
    k_params, k_img = jax.random.split(key)
    params = init_params(k_params, img_size=img_size, patch_size=patch_size,
                         in_channels=in_channels, embed_dim=embed_dim,
                         encoder_depth=encoder_depth, decoder_depth=decoder_depth,
                         mlp_ratio=mlp_ratio)
    x_img = jax.random.normal(k_img, (batch, in_channels, img_size, img_size), jnp.float32)

    out = vit_autoencoder_forward(x_img, params, num_heads=num_heads,
                                  patch_size=patch_size, in_channels=in_channels)
    out = jax.block_until_ready(out)
    assert out.shape == (batch, in_channels, img_size, img_size)

    ref = reference_forward(x_img, params, num_heads, patch_size, in_channels)
    ref = jax.block_until_ready(ref)
    assert jnp.allclose(out, ref, atol=5e-2, rtol=5e-2), "mismatch vs pure-JAX reference"

    print("KERNEL_OK")
</pallas_src>

<mosaic_0001>
module attributes {stable_mosaic.version = 11 : i64} {
  func.func @encoder_stack_kernel(%arg0: i32, %arg1: i32, %arg2: memref<1x16x48xbf16, #tpu.memory_space<vmem>>, %arg3: memref<48x32xbf16, #tpu.memory_space<vmem>>, %arg4: memref<1x32xf32, #tpu.memory_space<vmem>>, %arg5: memref<1x16x32xf32, #tpu.memory_space<vmem>>, %arg6: memref<1x32x96xbf16, #tpu.memory_space<vmem>>, %arg7: memref<1x1x96xf32, #tpu.memory_space<vmem>>, %arg8: memref<1x32x32xbf16, #tpu.memory_space<vmem>>, %arg9: memref<1x1x32xf32, #tpu.memory_space<vmem>>, %arg10: memref<1x1x32xf32, #tpu.memory_space<vmem>>, %arg11: memref<1x1x32xf32, #tpu.memory_space<vmem>>, %arg12: memref<1x32x128xbf16, #tpu.memory_space<vmem>>, %arg13: memref<1x1x128xf32, #tpu.memory_space<vmem>>, %arg14: memref<1x128x32xbf16, #tpu.memory_space<vmem>>, %arg15: memref<1x1x32xf32, #tpu.memory_space<vmem>>, %arg16: memref<1x1x32xf32, #tpu.memory_space<vmem>>, %arg17: memref<1x1x32xf32, #tpu.memory_space<vmem>>, %arg18: memref<1x16x32xbf16, #tpu.memory_space<vmem>>, %arg19: memref<16x32xf32, #tpu.memory_space<vmem>>) attributes {dimension_semantics = [#tpu.dimension_semantics<parallel>, #tpu.dimension_semantics<arbitrary>], iteration_bounds = array<i64: 2, 2>, scalar_prefetch = 0 : i64, scratch_operands = 1 : i64, tpu.core_type = #tpu.core_type<tc>, window_params = [{transform_indices = @transform_0, window_bounds = array<i64: 1, 16, 48>}, {pipeline_mode = #tpu.pipeline_mode<synchronous>, transform_indices = @transform_1, window_bounds = array<i64: 48, 32>}, {pipeline_mode = #tpu.pipeline_mode<synchronous>, transform_indices = @transform_2, window_bounds = array<i64: 1, 32>}, {pipeline_mode = #tpu.pipeline_mode<synchronous>, transform_indices = @transform_3, window_bounds = array<i64: 1, 16, 32>}, {transform_indices = @transform_4, window_bounds = array<i64: 1, 32, 96>}, {transform_indices = @transform_5, window_bounds = array<i64: 1, 1, 96>}, {transform_indices = @transform_6, window_bounds = array<i64: 1, 32, 32>}, {transform_indices = @transform_7, window_bounds = array<i64: 1, 1, 32>}, {transform_indices = @transform_8, window_bounds = array<i64: 1, 1, 32>}, {transform_indices = @transform_9, window_bounds = array<i64: 1, 1, 32>}, {transform_indices = @transform_10, window_bounds = array<i64: 1, 32, 128>}, {transform_indices = @transform_11, window_bounds = array<i64: 1, 1, 128>}, {transform_indices = @transform_12, window_bounds = array<i64: 1, 128, 32>}, {transform_indices = @transform_13, window_bounds = array<i64: 1, 1, 32>}, {transform_indices = @transform_14, window_bounds = array<i64: 1, 1, 32>}, {transform_indices = @transform_15, window_bounds = array<i64: 1, 1, 32>}, {transform_indices = @transform_16, window_bounds = array<i64: 1, 16, 32>}]} {
    %c0_i32 = arith.constant 0 : i32
    %0 = arith.cmpi eq, %arg1, %c0_i32 : i32
    %1 = arith.extui %0 : i1 to i32
    %c0_i32_0 = arith.constant 0 : i32
    %2 = arith.cmpi ne, %1, %c0_i32_0 : i32
    scf.if %2 {
      %c0_60 = arith.constant 0 : index
      %c0_61 = arith.constant 0 : index
      %c0_62 = arith.constant 0 : index
      %122 = vector.load %arg2[%c0_60, %c0_61, %c0_62] : memref<1x16x48xbf16, #tpu.memory_space<vmem>>, vector<1x16x48xbf16>
      %123 = vector.shape_cast %122 : vector<1x16x48xbf16> to vector<16x48xbf16>
      %c0_63 = arith.constant 0 : index
      %c0_64 = arith.constant 0 : index
      %124 = vector.load %arg3[%c0_63, %c0_64] : memref<48x32xbf16, #tpu.memory_space<vmem>>, vector<48x32xbf16>
      %cst_65 = arith.constant dense<0.000000e+00> : vector<16x32xf32>
      %125 = tpu.matmul %123, %124, %cst_65 {dimension_numbers = #tpu.dot_dimension_numbers<[1], [0], [0], [1], [0, 0, 1, 1], [], []>} : vector<16x48xbf16>, vector<48x32xbf16>, vector<16x32xf32> -> vector<16x32xf32>
      %c0_66 = arith.constant 0 : index
      %c0_67 = arith.constant 0 : index
      %126 = vector.load %arg4[%c0_66, %c0_67] : memref<1x32xf32, #tpu.memory_space<vmem>>, vector<1x32xf32>
      %127 = vector.broadcast %126 : vector<1x32xf32> to vector<16x32xf32>
      %128 = arith.addf %125, %127 : vector<16x32xf32>
      %c0_68 = arith.constant 0 : index
      %c0_69 = arith.constant 0 : index
      %c0_70 = arith.constant 0 : index
      %129 = vector.load %arg5[%c0_68, %c0_69, %c0_70] : memref<1x16x32xf32, #tpu.memory_space<vmem>>, vector<1x16x32xf32>
      %130 = vector.shape_cast %129 : vector<1x16x32xf32> to vector<16x32xf32>
      %131 = arith.addf %128, %130 : vector<16x32xf32>
      %c0_71 = arith.constant 0 : index
      %c0_72 = arith.constant 0 : index
      %132 = vector.load %arg19[%c0_71, %c0_72] : memref<16x32xf32, #tpu.memory_space<vmem>>, vector<16x32xf32>
      tpu.vector_store %arg19[%c0_71, %c0_72], %131 {strides = array<i32>} : memref<16x32xf32, #tpu.memory_space<vmem>>, vector<16x32xf32>,
    } else {
    }
    %c0 = arith.constant 0 : index
    %c0_1 = arith.constant 0 : index
    %3 = vector.load %arg19[%c0, %c0_1] : memref<16x32xf32, #tpu.memory_space<vmem>>, vector<16x32xf32>
    %c0_2 = arith.constant 0 : index
    %c0_3 = arith.constant 0 : index
    %c0_4 = arith.constant 0 : index
    %4 = vector.load %arg6[%c0_2, %c0_3, %c0_4] : memref<1x32x96xbf16, #tpu.memory_space<vmem>>, vector<1x32x96xbf16>
    %5 = vector.shape_cast %4 : vector<1x32x96xbf16> to vector<32x96xbf16>
    %c0_5 = arith.constant 0 : index
    %c0_6 = arith.constant 0 : index
    %c0_7 = arith.constant 0 : index
    %6 = vector.load %arg7[%c0_5, %c0_6, %c0_7] : memref<1x1x96xf32, #tpu.memory_space<vmem>>, vector<1x1x96xf32>
    %7 = vector.shape_cast %6 : vector<1x1x96xf32> to vector<1x96xf32>
    %c0_8 = arith.constant 0 : index
    %c0_9 = arith.constant 0 : index
    %c0_10 = arith.constant 0 : index
    %8 = vector.load %arg8[%c0_8, %c0_9, %c0_10] : memref<1x32x32xbf16, #tpu.memory_space<vmem>>, vector<1x32x32xbf16>
    %9 = vector.shape_cast %8 : vector<1x32x32xbf16> to vector<32x32xbf16>
    %c0_11 = arith.constant 0 : index
    %c0_12 = arith.constant 0 : index
    %c0_13 = arith.constant 0 : index
    %10 = vector.load %arg9[%c0_11, %c0_12, %c0_13] : memref<1x1x32xf32, #tpu.memory_space<vmem>>, vector<1x1x32xf32>
    %11 = vector.shape_cast %10 : vector<1x1x32xf32> to vector<1x32xf32>
    %12 = arith.truncf %3 : vector<16x32xf32> to vector<16x32xbf16>
    %cst = arith.constant dense<0.000000e+00> : vector<16x96xf32>
    %13 = tpu.matmul %12, %5, %cst {dimension_numbers = #tpu.dot_dimension_numbers<[1], [0], [0], [1], [0, 0, 1, 1], [], []>} : vector<16x32xbf16>, vector<32x96xbf16>, vector<16x96xf32> -> vector<16x96xf32>
    %14 = vector.broadcast %7 : vector<1x96xf32> to vector<16x96xf32>
    %15 = arith.addf %13, %14 : vector<16x96xf32>
    %16 = vector.extract_strided_slice %15 {offsets = [0, 0], sizes = [16, 32], strides = [1, 1]} : vector<16x96xf32> to vector<16x32xf32>
    %17 = vector.extract_strided_slice %15 {offsets = [0, 32], sizes = [16, 32], strides = [1, 1]} : vector<16x96xf32> to vector<16x32xf32>
    %18 = vector.extract_strided_slice %15 {offsets = [0, 64], sizes = [16, 32], strides = [1, 1]} : vector<16x96xf32> to vector<16x32xf32>
    %cst_14 = arith.constant 0.353553385 : f32
    %19 = vector.broadcast %cst_14 : f32 to vector<16x32xf32>
    %20 = arith.mulf %16, %19 : vector<16x32xf32>
    %21 = arith.truncf %20 : vector<16x32xf32> to vector<16x32xbf16>
    %22 = vector.shape_cast %21 : vector<16x32xbf16> to vector<16x4x8xbf16>
    %23 = arith.truncf %17 : vector<16x32xf32> to vector<16x32xbf16>
    %24 = vector.shape_cast %23 : vector<16x32xbf16> to vector<16x4x8xbf16>
    %25 = arith.truncf %18 : vector<16x32xf32> to vector<16x32xbf16>
    %26 = vector.shape_cast %25 : vector<16x32xbf16> to vector<16x4x8xbf16>
    "tpu.trace_start"() <{level = 10 : i32, message = "qhd,khd->hqk"}> : () -> ()
    %cst_15 = arith.constant dense<0.000000e+00> : vector<4x16x16xf32>
    %27 = tpu.matmul %22, %24, %cst_15 {dimension_numbers = #tpu.dot_dimension_numbers<[2], [2], [0], [0], [0, 1, 0, 0, 1, 0], [1], [1]>} : vector<16x4x8xbf16>, vector<16x4x8xbf16>, vector<4x16x16xf32> -> vector<4x16x16xf32>
    "tpu.trace_stop"() : () -> ()
    %cst_16 = arith.constant dense<0xFF800000> : vector<4x16xf32>
    %28 = vector.multi_reduction <maximumf>, %27, %cst_16 [2] : vector<4x16x16xf32> to vector<4x16xf32>
    %29 = vector.shape_cast %28 : vector<4x16xf32> to vector<4x16x1xf32>
    %30 = vector.broadcast %29 : vector<4x16x1xf32> to vector<4x16x16xf32>
    %31 = arith.subf %27, %30 : vector<4x16x16xf32>
    %32 = math.exp %31 : vector<4x16x16xf32>
    %cst_17 = arith.constant dense<0.000000e+00> : vector<4x16xf32>
    %33 = vector.multi_reduction <add>, %32, %cst_17 [2] : vector<4x16x16xf32> to vector<4x16xf32>
    %34 = vector.shape_cast %33 : vector<4x16xf32> to vector<4x16x1xf32>
    %35 = tpu.reciprocal %34 {approx = true} : vector<4x16x1xf32> -> vector<4x16x1xf32>
    %36 = vector.broadcast %35 : vector<4x16x1xf32> to vector<4x16x16xf32>
    %37 = arith.mulf %32, %36 : vector<4x16x16xf32>
    %38 = arith.truncf %37 : vector<4x16x16xf32> to vector<4x16x16xbf16>
    "tpu.trace_start"() <{level = 10 : i32, message = "hqk,khd->qhd"}> : () -> ()
    %cst_18 = arith.constant dense<0.000000e+00> : vector<4x8x16xf32>
    %39 = tpu.matmul %26, %38, %cst_18 {dimension_numbers = #tpu.dot_dimension_numbers<[0], [2], [2], [1], [0, 1, 0, 2, 1, 1], [1], [0]>} : vector<16x4x8xbf16>, vector<4x16x16xbf16>, vector<4x8x16xf32> -> vector<4x8x16xf32>
    %40 = tpu.transpose %39, [2, 0, 1] : vector<4x8x16xf32> -> vector<16x4x8xf32>
    "tpu.trace_stop"() : () -> ()
    %41 = vector.shape_cast %40 : vector<16x4x8xf32> to vector<16x32xf32>
    %42 = arith.truncf %41 : vector<16x32xf32> to vector<16x32xbf16>
    %cst_19 = arith.constant dense<0.000000e+00> : vector<16x32xf32>
    %43 = tpu.matmul %42, %9, %cst_19 {dimension_numbers = #tpu.dot_dimension_numbers<[1], [0], [0], [1], [0, 0, 1, 1], [], []>} : vector<16x32xbf16>, vector<32x32xbf16>, vector<16x32xf32> -> vector<16x32xf32>
    %44 = vector.broadcast %11 : vector<1x32xf32> to vector<16x32xf32>
    %45 = arith.addf %43, %44 : vector<16x32xf32>
    %46 = arith.addf %3, %45 : vector<16x32xf32>
    %c0_20 = arith.constant 0 : index
    %c0_21 = arith.constant 0 : index
    %c0_22 = arith.constant 0 : index
    %47 = vector.load %arg10[%c0_20, %c0_21, %c0_22] : memref<1x1x32xf32, #tpu.memory_space<vmem>>, vector<1x1x32xf32>
    %48 = vector.shape_cast %47 : vector<1x1x32xf32> to vector<1x32xf32>
    %c0_23 = arith.constant 0 : index
    %c0_24 = arith.constant 0 : index
    %c0_25 = arith.constant 0 : index
    %49 = vector.load %arg11[%c0_23, %c0_24, %c0_25] : memref<1x1x32xf32, #tpu.memory_space<vmem>>, vector<1x1x32xf32>
    %50 = vector.shape_cast %49 : vector<1x1x32xf32> to vector<1x32xf32>
    %cst_26 = arith.constant dense<0.000000e+00> : vector<16xf32>
    %51 = vector.multi_reduction <add>, %46, %cst_26 [1] : vector<16x32xf32> to vector<16xf32>
    %52 = vector.shape_cast %51 : vector<16xf32> to vector<16x1xf32>
    %cst_27 = arith.constant 3.200000e+01 : f32
    %53 = vector.broadcast %cst_27 : f32 to vector<16x1xf32>
    %54 = arith.divf %52, %53 : vector<16x1xf32>
    %55 = vector.broadcast %54 : vector<16x1xf32> to vector<16x32xf32>
    %56 = arith.subf %46, %55 : vector<16x32xf32>
    %57 = arith.mulf %56, %56 : vector<16x32xf32>
    %cst_28 = arith.constant dense<0.000000e+00> : vector<16xf32>
    %58 = vector.multi_reduction <add>, %57, %cst_28 [1] : vector<16x32xf32> to vector<16xf32>
    %59 = vector.shape_cast %58 : vector<16xf32> to vector<16x1xf32>
    %cst_29 = arith.constant 3.200000e+01 : f32
    %60 = vector.broadcast %cst_29 : f32 to vector<16x1xf32>
    %61 = arith.divf %59, %60 : vector<16x1xf32>
    %62 = vector.broadcast %54 : vector<16x1xf32> to vector<16x32xf32>
    %63 = arith.subf %46, %62 : vector<16x32xf32>
    %cst_30 = arith.constant 9.99999974E-6 : f32
    %64 = vector.broadcast %cst_30 : f32 to vector<16x1xf32>
    %65 = arith.addf %61, %64 : vector<16x1xf32>
    %66 = math.rsqrt %65 : vector<16x1xf32>
    %67 = vector.broadcast %66 : vector<16x1xf32> to vector<16x32xf32>
    %68 = arith.mulf %63, %67 : vector<16x32xf32>
    %69 = vector.broadcast %48 : vector<1x32xf32> to vector<16x32xf32>
    %70 = arith.mulf %68, %69 : vector<16x32xf32>
    %71 = vector.broadcast %50 : vector<1x32xf32> to vector<16x32xf32>
    %72 = arith.addf %70, %71 : vector<16x32xf32>
    %c0_31 = arith.constant 0 : index
    %c0_32 = arith.constant 0 : index
    %c0_33 = arith.constant 0 : index
    %73 = vector.load %arg12[%c0_31, %c0_32, %c0_33] : memref<1x32x128xbf16, #tpu.memory_space<vmem>>, vector<1x32x128xbf16>
    %74 = vector.shape_cast %73 : vector<1x32x128xbf16> to vector<32x128xbf16>
    %c0_34 = arith.constant 0 : index
    %c0_35 = arith.constant 0 : index
    %c0_36 = arith.constant 0 : index
    %75 = vector.load %arg13[%c0_34, %c0_35, %c0_36] : memref<1x1x128xf32, #tpu.memory_space<vmem>>, vector<1x1x128xf32>
    %76 = vector.shape_cast %75 : vector<1x1x128xf32> to vector<1x128xf32>
    %c0_37 = arith.constant 0 : index
    %c0_38 = arith.constant 0 : index
    %c0_39 = arith.constant 0 : index
    %77 = vector.load %arg14[%c0_37, %c0_38, %c0_39] : memref<1x128x32xbf16, #tpu.memory_space<vmem>>, vector<1x128x32xbf16>
    %78 = vector.shape_cast %77 : vector<1x128x32xbf16> to vector<128x32xbf16>
    %c0_40 = arith.constant 0 : index
    %c0_41 = arith.constant 0 : index
    %c0_42 = arith.constant 0 : index
    %79 = vector.load %arg15[%c0_40, %c0_41, %c0_42] : memref<1x1x32xf32, #tpu.memory_space<vmem>>, vector<1x1x32xf32>
    %80 = vector.shape_cast %79 : vector<1x1x32xf32> to vector<1x32xf32>
    %81 = arith.truncf %72 : vector<16x32xf32> to vector<16x32xbf16>
    %cst_43 = arith.constant dense<0.000000e+00> : vector<16x128xf32>
    %82 = tpu.matmul %81, %74, %cst_43 {dimension_numbers = #tpu.dot_dimension_numbers<[1], [0], [0], [1], [0, 0, 1, 1], [], []>} : vector<16x32xbf16>, vector<32x128xbf16>, vector<16x128xf32> -> vector<16x128xf32>
    %83 = vector.broadcast %76 : vector<1x128xf32> to vector<16x128xf32>
    %84 = arith.addf %82, %83 : vector<16x128xf32>
    %cst_44 = arith.constant 0.000000e+00 : f32
    %85 = vector.broadcast %cst_44 : f32 to vector<16x128xf32>
    %86 = arith.maximumf %84, %85 : vector<16x128xf32>
    %87 = arith.truncf %86 : vector<16x128xf32> to vector<16x128xbf16>
    %cst_45 = arith.constant dense<0.000000e+00> : vector<16x32xf32>
    %88 = tpu.matmul %87, %78, %cst_45 {dimension_numbers = #tpu.dot_dimension_numbers<[1], [0], [0], [1], [0, 0, 1, 1], [], []>} : vector<16x128xbf16>, vector<128x32xbf16>, vector<16x32xf32> -> vector<16x32xf32>
    %89 = vector.broadcast %80 : vector<1x32xf32> to vector<16x32xf32>
    %90 = arith.addf %88, %89 : vector<16x32xf32>
    %91 = arith.addf %72, %90 : vector<16x32xf32>
    %c0_46 = arith.constant 0 : index
    %c0_47 = arith.constant 0 : index
    %c0_48 = arith.constant 0 : index
    %92 = vector.load %arg16[%c0_46, %c0_47, %c0_48] : memref<1x1x32xf32, #tpu.memory_space<vmem>>, vector<1x1x32xf32>
    %93 = vector.shape_cast %92 : vector<1x1x32xf32> to vector<1x32xf32>
    %c0_49 = arith.constant 0 : index
    %c0_50 = arith.constant 0 : index
    %c0_51 = arith.constant 0 : index
    %94 = vector.load %arg17[%c0_49, %c0_50, %c0_51] : memref<1x1x32xf32, #tpu.memory_space<vmem>>, vector<1x1x32xf32>
    %95 = vector.shape_cast %94 : vector<1x1x32xf32> to vector<1x32xf32>
    %cst_52 = arith.constant dense<0.000000e+00> : vector<16xf32>
    %96 = vector.multi_reduction <add>, %91, %cst_52 [1] : vector<16x32xf32> to vector<16xf32>
    %97 = vector.shape_cast %96 : vector<16xf32> to vector<16x1xf32>
    %cst_53 = arith.constant 3.200000e+01 : f32
    %98 = vector.broadcast %cst_53 : f32 to vector<16x1xf32>
    %99 = arith.divf %97, %98 : vector<16x1xf32>
    %100 = vector.broadcast %99 : vector<16x1xf32> to vector<16x32xf32>
    %101 = arith.subf %91, %100 : vector<16x32xf32>
    %102 = arith.mulf %101, %101 : vector<16x32xf32>
    %cst_54 = arith.constant dense<0.000000e+00> : vector<16xf32>
    %103 = vector.multi_reduction <add>, %102, %cst_54 [1] : vector<16x32xf32> to vector<16xf32>
    %104 = vector.shape_cast %103 : vector<16xf32> to vector<16x1xf32>
    %cst_55 = arith.constant 3.200000e+01 : f32
    %105 = vector.broadcast %cst_55 : f32 to vector<16x1xf32>
    %106 = arith.divf %104, %105 : vector<16x1xf32>
    %107 = vector.broadcast %99 : vector<16x1xf32> to vector<16x32xf32>
    %108 = arith.subf %91, %107 : vector<16x32xf32>
    %cst_56 = arith.constant 9.99999974E-6 : f32
    %109 = vector.broadcast %cst_56 : f32 to vector<16x1xf32>
    %110 = arith.addf %106, %109 : vector<16x1xf32>
    %111 = math.rsqrt %110 : vector<16x1xf32>
    %112 = vector.broadcast %111 : vector<16x1xf32> to vector<16x32xf32>
    %113 = arith.mulf %108, %112 : vector<16x32xf32>
    %114 = vector.broadcast %93 : vector<1x32xf32> to vector<16x32xf32>
    %115 = arith.mulf %113, %114 : vector<16x32xf32>
    %116 = vector.broadcast %95 : vector<1x32xf32> to vector<16x32xf32>
    %117 = arith.addf %115, %116 : vector<16x32xf32>
    %c0_57 = arith.constant 0 : index
    %c0_58 = arith.constant 0 : index
    %118 = vector.load %arg19[%c0_57, %c0_58] : memref<16x32xf32, #tpu.memory_space<vmem>>, vector<16x32xf32>
    tpu.vector_store %arg19[%c0_57, %c0_58], %117 {strides = array<i32>} : memref<16x32xf32, #tpu.memory_space<vmem>>, vector<16x32xf32>,
    %c1_i32 = arith.constant 1 : i32
    %119 = arith.cmpi eq, %arg1, %c1_i32 : i32
    %120 = arith.extui %119 : i1 to i32
    %c0_i32_59 = arith.constant 0 : i32
    %121 = arith.cmpi ne, %120, %c0_i32_59 : i32
    scf.if %121 {
      %122 = arith.truncf %117 : vector<16x32xf32> to vector<16x32xbf16>
      %c0_60 = arith.constant 0 : index
      %c0_61 = arith.constant 0 : index
      %c0_62 = arith.constant 0 : index
      %123 = vector.load %arg18[%c0_60, %c0_61, %c0_62] : memref<1x16x32xbf16, #tpu.memory_space<vmem>>, vector<1x16x32xbf16>
      %124 = vector.shape_cast %123 : vector<1x16x32xbf16> to vector<16x32xbf16>
      %125 = vector.shape_cast %122 : vector<16x32xbf16> to vector<1x16x32xbf16>
      tpu.vector_store %arg18[%c0_60, %c0_61, %c0_62], %125 {strides = array<i32>} : memref<1x16x32xbf16, #tpu.memory_space<vmem>>, vector<1x16x32xbf16>,
    } else {
    }
    return
  }
  func.func @transform_0(%arg0: i32, %arg1: i32) -> (i32, i32, i32) {
    %c0_i32 = arith.constant 0 : i32
    %c0_i32_0 = arith.constant 0 : i32
    %c0_i32_1 = arith.constant 0 : i32
    return %arg0, %c0_i32, %c0_i32_0 : i32, i32, i32
  }
  func.func @transform_1(%arg0: i32, %arg1: i32) -> (i32, i32) {
    %c0_i32 = arith.constant 0 : i32
    %c0_i32_0 = arith.constant 0 : i32
    %c0_i32_1 = arith.constant 0 : i32
    return %c0_i32, %c0_i32_0 : i32, i32
  }
  func.func @transform_2(%arg0: i32, %arg1: i32) -> (i32, i32) {
    %c0_i32 = arith.constant 0 : i32
    %c0_i32_0 = arith.constant 0 : i32
    %c0_i32_1 = arith.constant 0 : i32
    return %c0_i32, %c0_i32_0 : i32, i32
  }
  func.func @transform_3(%arg0: i32, %arg1: i32) -> (i32, i32, i32) {
    %c0_i32 = arith.constant 0 : i32
    %c0_i32_0 = arith.constant 0 : i32
    %c0_i32_1 = arith.constant 0 : i32
    %c0_i32_2 = arith.constant 0 : i32
    return %c0_i32, %c0_i32_0, %c0_i32_1 : i32, i32, i32
  }
  func.func @transform_4(%arg0: i32, %arg1: i32) -> (i32, i32, i32) {
    %c0_i32 = arith.constant 0 : i32
    %c0_i32_0 = arith.constant 0 : i32
    %c0_i32_1 = arith.constant 0 : i32
    return %arg1, %c0_i32, %c0_i32_0 : i32, i32, i32
  }
  func.func @transform_5(%arg0: i32, %arg1: i32) -> (i32, i32, i32) {
    %c0_i32 = arith.constant 0 : i32
    %c0_i32_0 = arith.constant 0 : i32
    %c0_i32_1 = arith.constant 0 : i32
    return %arg1, %c0_i32, %c0_i32_0 : i32, i32, i32
  }
  func.func @transform_6(%arg0: i32, %arg1: i32) -> (i32, i32, i32) {
    %c0_i32 = arith.constant 0 : i32
    %c0_i32_0 = arith.constant 0 : i32
    %c0_i32_1 = arith.constant 0 : i32
    return %arg1, %c0_i32, %c0_i32_0 : i32, i32, i32
  }
  func.func @transform_7(%arg0: i32, %arg1: i32) -> (i32, i32, i32) {
    %c0_i32 = arith.constant 0 : i32
    %c0_i32_0 = arith.constant 0 : i32
    %c0_i32_1 = arith.constant 0 : i32
    return %arg1, %c0_i32, %c0_i32_0 : i32, i32, i32
  }
  func.func @transform_8(%arg0: i32, %arg1: i32) -> (i32, i32, i32) {
    %c0_i32 = arith.constant 0 : i32
    %c0_i32_0 = arith.constant 0 : i32
    %c0_i32_1 = arith.constant 0 : i32
    return %arg1, %c0_i32, %c0_i32_0 : i32, i32, i32
  }
  func.func @transform_9(%arg0: i32, %arg1: i32) -> (i32, i32, i32) {
    %c0_i32 = arith.constant 0 : i32
    %c0_i32_0 = arith.constant 0 : i32
    %c0_i32_1 = arith.constant 0 : i32
    return %arg1, %c0_i32, %c0_i32_0 : i32, i32, i32
  }
  func.func @transform_10(%arg0: i32, %arg1: i32) -> (i32, i32, i32) {
    %c0_i32 = arith.constant 0 : i32
    %c0_i32_0 = arith.constant 0 : i32
    %c0_i32_1 = arith.constant 0 : i32
    return %arg1, %c0_i32, %c0_i32_0 : i32, i32, i32
  }
  func.func @transform_11(%arg0: i32, %arg1: i32) -> (i32, i32, i32) {
    %c0_i32 = arith.constant 0 : i32
    %c0_i32_0 = arith.constant 0 : i32
    %c0_i32_1 = arith.constant 0 : i32
    return %arg1, %c0_i32, %c0_i32_0 : i32, i32, i32
  }
  func.func @transform_12(%arg0: i32, %arg1: i32) -> (i32, i32, i32) {
    %c0_i32 = arith.constant 0 : i32
    %c0_i32_0 = arith.constant 0 : i32
    %c0_i32_1 = arith.constant 0 : i32
    return %arg1, %c0_i32, %c0_i32_0 : i32, i32, i32
  }
  func.func @transform_13(%arg0: i32, %arg1: i32) -> (i32, i32, i32) {
    %c0_i32 = arith.constant 0 : i32
    %c0_i32_0 = arith.constant 0 : i32
    %c0_i32_1 = arith.constant 0 : i32
    return %arg1, %c0_i32, %c0_i32_0 : i32, i32, i32
  }
  func.func @transform_14(%arg0: i32, %arg1: i32) -> (i32, i32, i32) {
    %c0_i32 = arith.constant 0 : i32
    %c0_i32_0 = arith.constant 0 : i32
    %c0_i32_1 = arith.constant 0 : i32
    return %arg1, %c0_i32, %c0_i32_0 : i32, i32, i32
  }
  func.func @transform_15(%arg0: i32, %arg1: i32) -> (i32, i32, i32) {
    %c0_i32 = arith.constant 0 : i32
    %c0_i32_0 = arith.constant 0 : i32
    %c0_i32_1 = arith.constant 0 : i32
    return %arg1, %c0_i32, %c0_i32_0 : i32, i32, i32
  }
  func.func @transform_16(%arg0: i32, %arg1: i32) -> (i32, i32, i32) {
    %c0_i32 = arith.constant 0 : i32
    %c0_i32_0 = arith.constant 0 : i32
    %c0_i32_1 = arith.constant 0 : i32
    return %arg0, %c0_i32, %c0_i32_0 : i32, i32, i32
  }
}

</mosaic_0001>

<bundles_post_ra>
// kernel: tpu_custom_call.1
= control target key start
LH: loop header
LB: loop body
LE: loop exit
PB: predicated region body
PF: predicated region fallthrough
CT: control target
= control target key end

     0   :  { %s3518_s0 = inlined_call_operand.vmem [shape: bf16[2,16,48], index: 0, kind: input, shape index: {}]   ;;  %s3519_s1 = inlined_call_operand.vmem [shape: bf16[48,32], index: 1, kind: input, shape index: {}]   ;;  %s3520_s2 = inlined_call_operand.vmem [shape: f32[1,32], index: 2, kind: input, shape index: {}]   ;;  %s3521_s3 = inlined_call_operand.vmem [shape: f32[1,16,32], index: 3, kind: input, shape index: {}]   ;;  %s3522_s4 = inlined_call_operand.vmem [shape: bf16[2,32,96], index: 4, kind: input, shape index: {}]   ;;  %s3523_s5 = inlined_call_operand.vmem [shape: f32[2,1,96], index: 5, kind: input, shape index: {}]   ;;  %s3524_s6 = inlined_call_operand.vmem [shape: bf16[2,32,32], index: 6, kind: input, shape index: {}]   ;;  %s3525_s7 = inlined_call_operand.vmem [shape: f32[2,1,32], index: 7, kind: input, shape index: {}]   ;;  %s3526_s8 = inlined_call_operand.vmem [shape: f32[2,1,32], index: 8, kind: input, shape index: {}]   ;;  %s3527_s9 = inlined_call_operand.vmem [shape: f32[2,1,32], index: 9, kind: input, shape index: {}]   ;;  %s3528_s10 = inlined_call_operand.vmem [shape: bf16[2,32,128], index: 10, kind: input, shape index: {}]   ;;  %s3529_s11 = inlined_call_operand.vmem [shape: f32[2,1,128], index: 11, kind: input, shape index: {}]   ;;  %s3530_s12 = inlined_call_operand.vmem [shape: bf16[2,128,32], index: 12, kind: input, shape index: {}]   ;;  %s3531_s13 = inlined_call_operand.vmem [shape: f32[2,1,32], index: 13, kind: input, shape index: {}]   ;;  %s3532_s14 = inlined_call_operand.vmem [shape: f32[2,1,32], index: 14, kind: input, shape index: {}]   ;;  %s3533_s15 = inlined_call_operand.vmem [shape: f32[2,1,32], index: 15, kind: input, shape index: {}]   ;;  %s3534_s16 = inlined_call_operand.hbm [shape: bf16[2,16,32], index: 16, kind: output, shape index: {}]  }
   0x1   :  { %3553 = sst [smem:[#allocation20_spill]] %s3518_s0 }
   0x2   :  { %3554 = sst [smem:[#allocation21_spill]] %s3519_s1 }
   0x3   :  { %3555 = sst [smem:[#allocation22_spill]] %s3520_s2 }
   0x4   :  { %3556 = sst [smem:[#allocation23_spill]] %s3521_s3 }
   0x5   :  { %3557 = sst [smem:[#allocation24_spill]] %s3522_s4 }
   0x6   :  { %3558 = sst [smem:[#allocation25_spill]] %s3524_s6 }
   0x7   :  { %3559 = sst [smem:[#allocation26_spill]] %s3534_s16 }
   0x8   :  { %21 = vsyncpa [#allocation4], 0 }
   0x9   :  { %23 = vsyncpa [#allocation4 + $0x1], 0  ;;  %s3097_s21 = smov 0   ;;  %s3099_s22 = smov 0  }
   0xa   :  { %s3101_s23 = smov 0   ;;  %s3103_s24 = smov 0  }
   0xb   :  { %s3105_s25 = smov 0   ;;  %s3107_s26 = smov 0  }
   0xc   :  { %s3109_s27 = smov 0   ;;  %s3111_s28 = smov 0  }
   0xd LB: > { %3560 = sst [smem:[#allocation6_spill]] %s2966_s21  ;;  %s2526_s29 = sadd.s32 4294967295, %s2994_s28   ;;  %s2994_s28 = sphi %s3111_s28, %s29_s28   ;;  %s2990_s27 = sphi %s3109_s27, %s3605_s27   ;;  %s2986_s26 = sphi %s3107_s26, %s3604_s26   ;;  %s2982_s25 = sphi %s3105_s25, %s3603_s25   ;;  %s2978_s24 = sphi %s3103_s24, %s3602_s24   ;;  %s2974_s23 = sphi %s3101_s23, %s3601_s23   ;;  %s2970_s22 = sphi %s3099_s22, %s3600_s22   ;;  %s2966_s21 = sphi %s3097_s21, %s3599_s21  }
   0xe   : > { %3561 = sst [smem:[#allocation7_spill]] %s2970_s22  ;;  %s2527_s30 = sadd.s32 4294967294, %s2994_s28  }
   0xf   : > { %3562 = sst [smem:[#allocation8_spill]] %s2974_s23  ;;  %s38_s0 = sadd.s32 1, %s2986_s26 }
  0x10   : > { %3563 = sst [smem:[#allocation9_spill]] %s2978_s24  ;;  %p39_p0 = scmp.ge.s32.totalorder %s38_s0, 2 }
  0x11   : > { %3564 = sst [smem:[#allocation10_spill]] %s2982_s25  ;;  %s41_s17 = sadd.s32 1, %s2990_s27 }
  0x12   : > { %3565 = sst [smem:[#allocation11_spill]] %s2986_s26  ;;  %p459_p1 = scmp.ne.s32.totalorder %s2974_s23, %s2970_s22 }
  0x13   : > { %3566 = sst [smem:[#allocation12_spill]] %s2990_s27  ;;  %p460_p2 = scmp.eq.s32.totalorder %s2526_s29, 3 }
  0x14   : > { %3567 = sst [smem:[#allocation13_spill]] %s2994_s28  ;;  %s3607_s0 = smov (%p39_p0, %s38_s0), 0 }
  0x15   : > { %3568 = sst [smem:[#allocation14_spill]] %s3607_s0  ;;  %s3609_s17 = smov (!%p39_p0, %s41_s17), %s2990_s27 }
  0x16   : > { %p3146_p3 = por %p460_p2, %p459_p1  ;;  %p465_p4 = scmp.ne.s32.totalorder %s2970_s22, %s2966_s21 }
  0x17   : > { %p43_p5 = scmp.ge.s32.totalorder %s3609_s17, 2  ;;  %p466_p6 = scmp.eq.s32.totalorder %s2527_s30, 3 }
  0x18   : > { %s3569_s18 = scalar_select %p3146_p3, 1, 0 }
  0x19   : > { %p2530_p7 = scmp.ge.s32.totalorder %s2994_s28, 1  ;;  %p581_p8 = scmp.lt.s32.totalorder %s2994_s28, 5 }
  0x1a   : > { %3570 = sst [smem:[#allocation15_spill]] %s3569_s18  ;;  %s3611_s17 = smov (%p43_p5, %s3609_s17), 0 }
  0x1b   : > { %3571 = sst [smem:[#allocation16_spill]] %s3611_s17  ;;  %p3156_p9 = por %p466_p6, %p465_p4 }
  0x1c   : > { %p582_p10 = pnand %p2530_p7, %p581_p8  ;;  %s446_s20 = ssub.s32 %s2990_s27, %s3611_s17 }
  0x1d   : > { %s3572_s19 = scalar_select %p3156_p9, 1, 0 }
  0x1e   : > { %s449_s29 = sadd.s32 1, %s2974_s23  ;;  %p447_p11 = scmp.eq.s32.totalorder %s446_s20, 0 }
  0x1f   : > { %3573 = sst [smem:[#allocation17_spill]] %s3572_s19  ;;  %585 = sbr.rel (%p582_p10) target bundleno = 3145 (0xc49), region = 84 }
  0x20   : > { %s3164_s0 = scalar_select %p447_p11, %s2974_s23, %s449_s29  }
  0x22   : > { %3574 = sst [smem:[#allocation18_spill]] %s3164_s0 }
  0x24   : > { %s3540_s30 = sand.u32 1, %s2970_s22   ;;  %p675_p12 = scmp.lt.s32.totalorder %s2982_s25, 1 }
  0x25   : > { %s2531_s26 = sshll.u32 %s3540_s30, 3  ;;  %p680_p13 = scmp.lt.s32.totalorder %s2978_s24, 1 }
  0x26   : > { %s676_s21 = scalar_select %p675_p12, %s2982_s25, 1 }
  0x27   : > { %s3173_s19 = scalar_select %p680_p13, %s2978_s24, 1 }
  0x28   : > { %s2594_s20 = sshll.u32 %s676_s21, 3  ;;  %s3575_s27 = sld [smem:[#allocation20_spill]] }
  0x29   : > { %s2595_s30 = sshll.u32 %s3173_s19, 4  ;;  %s3576_s4 = sld [smem:[#allocation24_spill]] }
  0x2a   : > { %s3578_s6 = sld [smem:[#allocation25_spill]]  ;;  %s3208_s18 = scalar_lea.vmem %s3528_s10, %s2595_s30 }
  0x2b   : > { %s709_s25 = scalar_lea.vmem %s3529_s11, %s3173_s19  ;;  %s3232_s2 = scalar_lea.vmem [#allocation3], %s2531_s26 }
  0x2c   : > { %s3579_s3 = sld [smem:[#allocation9_spill]] }
  0x2e   : > { %s679_s0 = scalar_lea.vmem %s3575_s27, %s2594_s20 }
  0x2f   : > { %s3182_s16 = scalar_lea.vmem %s3576_s4, %s2595_s30  ;;  %s723_s4 = scalar_lea.vmem %s3533_s15, %s3173_s19 }
  0x30   : > { %3577 = sst [smem:[#allocation19_spill]] %s3182_s16  ;;  %s3191_s1 = scalar_lea.vmem %s3578_s6, %s2595_s30 }
  0x31   : > { %s2598_s6 = sshll.u32 %s3173_s19, 6  ;;  %s720_s16 = scalar_lea.vmem %s3532_s14, %s3173_s19 }
  0x32   : > { %s3222_s29 = scalar_lea.vmem %s3530_s12, %s2598_s6  ;;  %p2542_p0 = scmp.ne.s32.totalorder %s3579_s3, 0 }
  0x33   : > { %s3580_s17 = sld [smem:[#allocation21_spill]] (!%p2542_p0) }
  0x34   : > { %728 = sbr.rel (%p2542_p0) target bundleno = 272 (0x110), region = 88  ;;  %s3581_s30 = sld [smem:[#allocation22_spill]] (!%p2542_p0) }
  0x35   : > { %s3582_s24 = sld [smem:[#allocation23_spill]] (!%p2542_p0) }
  0x39   : > { %v2829_v0 = vld [vmem:[%s3580_s17 + $0x10] sm:$0xff]   ;;  %v2996_v1 = vmov 0.0   ;;  %v2830_v2 = vld [vmem:[%s3580_s17 + $0x8] sm:$0xff]   ;;  %vm2997_vm0 = vmmov 0   ;;  %v2831_v3 = vld [vmem:[%s3580_s17] sm:$0xff]   ;;  %vm767_vm1 = vcmask 392192  }
  0x3a   : > { %2640 = vmatprep.subr.bf16.mxu0 %v2996_v1  ;;  %2646 = vmatprep.mubr.msk.bf16.mxu0 %vm2997_vm0, %v2996_v1  ;;  %v2832_v4 = vld [vmem:[%s679_s0] sm:$0xff]   ;;  %vm816_vm2 = vcmask 261120  }
  0x3b   : > { %2641 = vmatpush3.bf16.msra.mxu0 %v2829_v0  ;;  %v2543_v5 = vld [vmem:[%s3581_s30] ss:$0 sm:$0xff]  ;;  %s3583_s6 = smov %s3582_s24 }
  0x3c   : > { %2642 = vmatprep.subr.bf16.mxu0 %v2996_v1  ;;  %v812_v7 = vld [vmem:[%s3582_s24] sm:$0xff]  ;;  %v813_v12 = vld [vmem:[%s3583_s6 + $0x8] sm:$0xff] }
  0x3f   : > { %2643 = vmatpush3.bf16.msra.mxu0 %v2830_v2 }
  0x40   : > { %2644 = vmatprep.subr.bf16.mxu0 %v2996_v1 }
  0x43   : > { %2645 = vmatpush3.bf16.msra.mxu0 %v2831_v3 }
  0x46   : > { %2647 = vmatmul.mubr.msk.bf16.vlgmr.msra.gmra.mxu0 %vm767_vm1, %v2832_v4 }
 0x106   : > { %v805_v6 = vpop.f32.mrf.mxu0 }
 0x107   : > { %v806_v8 = vadd.f32 %v2543_v5, %v805_v6 }
 0x108   : > { %v2648_v9 = vpop.f32.mrf.mxu0 }
 0x109   : > { %v814_v10 = vadd.f32 %v812_v7, %v806_v8 }
 0x10a   : > { %v808_v11 = vpop.f32.mrf.mxu0 }
 0x10b   : > { %817 = vst.msk [vmem:[#allocation2] sm:$0xff] %vm816_vm2, %v814_v10  ;;  %v809_v13 = vadd.f32 %v2543_v5, %v808_v11 }
 0x10c   : > { %v2649_v14 = vpop.f32.mrf.mxu0 }
 0x10d   : > { %v815_v15 = vadd.f32 %v813_v12, %v809_v13 }
 0x10f   : > { %818 = vst.msk [vmem:[#allocation2 + $0x8] sm:$0xff] %vm816_vm2, %v815_v15 }
 0x110 PF: > { %s3584_s0 = sld [smem:[#allocation19_spill]]  ;;  %v2998_v17 = vmov 0.0   ;;  %vm2999_vm3 = vmmov 0   ;;  %vm850_vm4 = vcmask 261120   ;;  %s3585_s23 = scalar_lea.vmem %s3523_s5, %s3173_s19  ;;  %vm993_vm5 = vcmask 1043456  }
 0x111   : > { %2650 = vmatprep.subr.bf16.mxu1 %v2998_v17  ;;  %2670 = vmatprep.subr.bf16.mxu0 %v2998_v17  ;;  %v2549_v22 = vld [vmem:[%s3585_s23] ss:$0 sm:$0xff]  ;;  %s3000_s28 = smov 104   ;;  %s3001_s30 = smov 120   ;;  %vm989_vm6 = vcmask 64512   ;;  %vm1179_vm7 = vcmask 130048  }
 0x112   : > { %2654 = vmatprep.mubr.msk.bf16.mxu1 %vm2999_vm3, %v2998_v17  ;;  %v3259_v19 = vld [vmem:[#allocation2] sm:$0xff]  ;;  %2672 = vmatprep.mubr.msk.bf16.mxu0 %vm2999_vm3, %v2998_v17  ;;  %s3002_s22 = smov 96   ;;  %s3003_s3 = smov 112   ;;  %vm1960_vm8 = vcmask 195584  }
 0x113   : > { %s3004_s24 = smov 64   ;;  %s3008_s21 = smov 8  }
 0x114   : > { %s3009_s27 = smov 24   ;;  %s3586_s20 = scalar_lea.vmem %s3525_s7, %s3173_s19 }
 0x115   : > { %s3590_s23 = sld [smem:[#allocation9_spill]] }
 0x116   : > { %v2848_v16 = vld [vmem:[%s3584_s0 + $0x8] sm:$0xff]   ;;  %v2849_v18 = vld [vmem:[%s3584_s0] sm:$0xff]  }
 0x117   : > { %2651 = vmatpush3.bf16.msra.mxu1 %v2848_v16  ;;  %v3261_v20 = vld [vmem:[#allocation2 + $0x8] sm:$0xff] }
 0x118   : > { %2652 = vmatprep.subr.bf16.mxu1 %v2998_v17  ;;  %v831_v21 = vpack.c.bf16 %v3261_v20, %v3259_v19 }
 0x11b   : > { %2653 = vmatpush3.bf16.msra.mxu1 %v2849_v18  ;;  %p2586_p1 = scmp.ne.s32.totalorder %s3590_s23, 1 }
 0x11c   : > { %2658 = vmatprep.subr.bf16.mxu1 %v2998_v17 }
 0x11e   : > { %2655 = vmatmul.mubr.msk.bf16.vlgmr.msra.gmra.mxu1 %vm850_vm4, %v831_v21 }
 0x11f   : > { %2660 = vmatprep.mubr.msk.bf16.mxu1 %vm2999_vm3, %v2998_v17 }
 0x1de   : > { %v888_v23 = vpop.f32.mrf.mxu1 }
 0x1df   : > { %v889_v25 = vadd.f32 %v2549_v22, %v888_v23 }
 0x1e0   : > { %v2656_v24 = vpop.f32.mrf.mxu1 }
 0x1e1   : > { %v895_v29 = vmul.f32 0.35355338, %v889_v25 }
 0x1e2   : > { %v891_v26 = vpop.f32.mrf.mxu1 }
 0x1e3   : > { %v892_v27 = vadd.f32 %v2549_v22, %v891_v26 }
 0x1e4   : > { %v2657_v28 = vpop.f32.mrf.mxu1 }
 0x1e5   : > { %v896_v30 = vmul.f32 0.35355338, %v892_v27  ;;  %v3277_v31 = vpack.c.bf16 %v892_v27, %v889_v25 }
 0x1e7   : > { %v897_v32 = vpack.c.bf16 %v896_v30, %v895_v29  ;;  %911 = vrot.lane.b32.xlu1 %v3277_v31, %s3000_s28  ;;  %907 = vrot.lane.b32.xlu0 %v3277_v31, %s3001_s30 }
 0x1eb   : > { %913 = vrot.lane.b32.xlu1 %v3277_v31, %s3002_s22  ;;  %909 = vrot.lane.b32.xlu0 %v3277_v31, %s3003_s3 }
 0x259   : > { %v3283_v33 = vpop.permute.xlu0 %907  ;;  %v3286_v34 = vpop.permute.xlu1 %911 }
 0x25a   : > { %915 = vrot.lane.b32.xlu0 %v3283_v33, %s3002_s22 }
 0x25d   : > { %v3288_v35 = vpop.permute.xlu0 %909  ;;  %v914_v36 = vpop.permute.xlu1 %913 }
 0x25e   : > { %919 = vrot.lane.b32.xlu0 %v3286_v34, %s3002_s22  ;;  %917 = vrot.lane.b32.xlu1 %v3288_v35, %s3002_s22 }
 0x262   : > { %901 = vrot.lane.b32.xlu0 %v897_v32, %s3003_s3  ;;  %899 = vrot.lane.b32.xlu1 %v897_v32, %s3001_s30  ;;  %s3588_s3 = scalar_lea.vmem %s3527_s9, %s3173_s19 }
 0x266   : > { %903 = vrot.lane.b32.xlu1 %v897_v32, %s3000_s28  ;;  %s3587_s28 = scalar_lea.vmem %s3526_s8, %s3173_s19 }
 0x280   : > { %925 = vxpose.xlu0.c.b16.start.end [1/1] (short) (narrow) %v914_v36, 16 }
 0x2cc   : > { %v916_v37 = vpop.permute.xlu0 %915 }
 0x2cd   : > { %941 = vxpose.xlu1.c.b16.start.end [1/1] (short) (narrow) %v916_v37, 16 }
 0x2d0   : > { %v918_v38 = vpop.permute.xlu1 %917  ;;  %v920_v39 = vpop.permute.xlu0 %919 }
 0x2d1   : > { %957 = vxpose.xlu0.c.b16.start.end [1/1] (short) (narrow) %v918_v38, 16 }
 0x2d4   : > { %v902_v40 = vpop.permute.xlu0 %901  ;;  %v900_v43 = vpop.permute.xlu1 %899 }
 0x2d5   : > { %973 = vxpose.xlu0.c.b16.start.end [1/1] (short) (narrow) %v920_v39, 16 }
 0x2d8   : > { %v904_v44 = vpop.permute.xlu1 %903 }
 0x2e2   : > { %v933_v41 = vpop.trf.xlu0 }
 0x2e3   : > { %v995_v42 = vsel %vm993_vm5, %v933_v41, 0 }
 0x2e4   : > { %2659 = vmatpush3.bf16.msra.mxu1 %v995_v42 }
 0x2e5   : > { %2664 = vmatprep.subr.bf16.mxu1 %v2998_v17 }
 0x2e7   : > { %2661 = vmatmul.mubr.msk.bf16.vlgmr.msra.gmra.mxu1 %vm989_vm6, %v897_v32 }
 0x2e8   : > { %2666 = vmatprep.mubr.msk.bf16.mxu1 %vm2999_vm3, %v2998_v17 }
 0x32f   : > { %v949_v45 = vpop.trf.xlu1 }
 0x330   : > { %v1042_v46 = vsel %vm993_vm5, %v949_v45, 0 }
 0x331   : > { %2665 = vmatpush3.bf16.msra.mxu1 %v1042_v46 }
 0x332   : > { %2676 = vmatprep.subr.bf16.mxu1 %v2998_v17 }
 0x333   : > { %v965_v47 = vpop.trf.xlu0 }
 0x334   : > { %2667 = vmatmul.mubr.msk.bf16.vlgmr.msra.gmra.mxu1 %vm989_vm6, %v900_v43  ;;  %v1089_v48 = vsel %vm993_vm5, %v965_v47, 0 }
 0x335   : > { %2671 = vmatpush3.bf16.msra.mxu0 %v1089_v48  ;;  %2678 = vmatprep.mubr.msk.bf16.mxu1 %vm2999_vm3, %v2998_v17 }
 0x336   : > { %2682 = vmatprep.subr.bf16.mxu0 %v2998_v17 }
 0x337   : > { %v981_v49 = vpop.trf.xlu0 }
 0x338   : > { %v1136_v50 = vsel %vm993_vm5, %v981_v49, 0  ;;  %2673 = vmatmul.mubr.msk.bf16.vlgmr.msra.gmra.mxu0 %vm989_vm6, %v902_v40 }
 0x339   : > { %2677 = vmatpush3.bf16.msra.mxu1 %v1136_v50  ;;  %2684 = vmatprep.mubr.msk.bf16.mxu0 %vm2999_vm3, %v2998_v17 }
 0x33a   : > { %2688 = vmatprep.subr.bf16.mxu1 %v2998_v17 }
 0x33c   : > { %2679 = vmatmul.mubr.msk.bf16.vlgmr.msra.gmra.mxu1 %vm989_vm6, %v904_v44 }
 0x33d   : > { %2690 = vmatprep.mubr.msk.bf16.mxu1 %vm2999_vm3, %v2998_v17 }
 0x3a7   : > { %v1031_v51 = vpop.f32.mrf.mxu1 }
 0x3a8   : > { %v1180_v52 = vsel %vm1179_vm7, %v1031_v51, -inf }
 0x3a9   : > { %1181 = vmax.xlane.f32.xlu1 %v1180_v52  ;;  %v2662_v53 = vpop.f32.mrf.mxu1 }
 0x3ab   : > { %v1034_v54 = vpop.f32.mrf.mxu1 }
 0x3ac   : > { %v1183_v55 = vsel %vm1179_vm7, %v1034_v54, -inf }
 0x3ad   : > { %1184 = vmax.xlane.f32.xlu0 %v1183_v55  ;;  %v2663_v56 = vpop.f32.mrf.mxu1 }
 0x3f4   : > { %v1078_v57 = vpop.f32.mrf.mxu1 }
 0x3f5   : > { %v1186_v58 = vsel %vm1179_vm7, %v1078_v57, -inf }
 0x3f6   : > { %1187 = vmax.xlane.f32.xlu1 %v1186_v58  ;;  %v2668_v59 = vpop.f32.mrf.mxu1 }
 0x3f8   : > { %v1081_v60 = vpop.f32.mrf.mxu1  ;;  %v1125_v61 = vpop.f32.mrf.mxu0 }
 0x3f9   : > { %v1192_v62 = vsel %vm1179_vm7, %v1125_v61, -inf  ;;  %v1189_v63 = vsel %vm1179_vm7, %v1081_v60, -inf }
 0x3fa   : > { %v2674_v0 = vpop.f32.mrf.mxu0  ;;  %1193 = vmax.xlane.f32.xlu1 %v1192_v62  ;;  %1190 = vmax.xlane.f32.xlu0 %v1189_v63  ;;  %v2669_v1 = vpop.f32.mrf.mxu1 }
 0x3fc   : > { %v1128_v2 = vpop.f32.mrf.mxu0  ;;  %v1172_v3 = vpop.f32.mrf.mxu1 }
 0x3fd   : > { %v1195_v4 = vsel %vm1179_vm7, %v1128_v2, -inf  ;;  %v1198_v5 = vsel %vm1179_vm7, %v1172_v3, -inf }
 0x3fe   : > { %v2675_v6 = vpop.f32.mrf.mxu0  ;;  %1196 = vmax.xlane.f32.xlu0 %v1195_v4  ;;  %1199 = vmax.xlane.f32.xlu1 %v1198_v5  ;;  %v2680_v7 = vpop.f32.mrf.mxu1 }
 0x400   : > { %v1175_v8 = vpop.f32.mrf.mxu1 }
 0x401   : > { %v1201_v9 = vsel %vm1179_vm7, %v1175_v8, -inf }
 0x402   : > { %1202 = vmax.xlane.f32.xlu0 %v1201_v9  ;;  %v2681_v10 = vpop.f32.mrf.mxu1 }
 0x40f   : > { %1272 = vrot.lane.b32.xlu1 %v3277_v31, %s3004_s24 }
 0x418   : > { %1274 = vrot.lane.b32.xlu0 %v3283_v33, %s3004_s24 }
 0x432   : > { %v1182_v11 = vpop.xlane.xlu1 %1181 }
 0x433   : > { %v1204_v12 = vsub.f32 %v1031_v51, %v1182_v11 }
 0x435   : > { %v1212_v13 = vmul.f32 1.442695, %v1204_v12 }
 0x436   : > { %v1185_v14 = vpop.xlane.xlu0 %1184 }
 0x437   : > { %2862 = vpow2.f32 %v1212_v13  ;;  %v1205_v15 = vsub.f32 %v1034_v54, %v1185_v14 }
 0x439   : > { %v1214_v16 = vmul.f32 1.442695, %v1205_v15 }
 0x43b   : > { %2864 = vpow2.f32 %v1214_v16 }
 0x444   : > { %v2863_v18 = vpop.eup %2862 }
 0x445   : > { %v1228_v21 = vsel %vm1179_vm7, %v2863_v18, 0.0 }
 0x446   : > { %1229 = vadd.xlane.f32.xlu1 %v1228_v21 }
 0x448   : > { %v2865_v22 = vpop.eup %2864 }
 0x449   : > { %v1231_v23 = vsel %vm1179_vm7, %v2865_v22, 0.0 }
 0x44a   : > { %1232 = vadd.xlane.f32.xlu0 %v1231_v23 }
 0x47f   : > { %v1188_v24 = vpop.xlane.xlu1 %1187 }
 0x480   : > { %v1206_v25 = vsub.f32 %v1078_v57, %v1188_v24 }
 0x482   : > { %v1216_v26 = vmul.f32 1.442695, %v1206_v25 }
 0x483   : > { %v1194_v27 = vpop.xlane.xlu1 %1193  ;;  %v1191_v28 = vpop.xlane.xlu0 %1190 }
 0x484   : > { %2866 = vpow2.f32 %v1216_v26  ;;  %v1208_v29 = vsub.f32 %v1125_v61, %v1194_v27  ;;  %v1207_v30 = vsub.f32 %v1081_v60, %v1191_v28 }
 0x486   : > { %v1220_v31 = vmul.f32 1.442695, %v1208_v29  ;;  %v1218_v32 = vmul.f32 1.442695, %v1207_v30 }
 0x487   : > { %v1197_v33 = vpop.xlane.xlu0 %1196  ;;  %v1200_v36 = vpop.xlane.xlu1 %1199 }
 0x488   : > { %2868 = vpow2.f32 %v1220_v31  ;;  %v1209_v37 = vsub.f32 %v1128_v2, %v1197_v33  ;;  %v1210_v38 = vsub.f32 %v1172_v3, %v1200_v36 }
 0x489   : > { %2870 = vpow2.f32 %v1218_v32 }
 0x48a   : > { %v1222_v39 = vmul.f32 1.442695, %v1209_v37  ;;  %v1224_v40 = vmul.f32 1.442695, %v1210_v38 }
 0x48b   : > { %v1203_v41 = vpop.xlane.xlu0 %1202  ;;  %v1273_v56 = vpop.permute.xlu1 %1272 }
 0x48c   : > { %2872 = vpow2.f32 %v1222_v39  ;;  %v1211_v42 = vsub.f32 %v1175_v8, %v1203_v41 }
 0x48d   : > { %2874 = vpow2.f32 %v1224_v40 }
 0x48e   : > { %v1226_v43 = vmul.f32 1.442695, %v1211_v42 }
 0x48f   : > { %v1275_v57 = vpop.permute.xlu0 %1274 }
 0x490   : > { %2876 = vpow2.f32 %v1226_v43 }
 0x491   : > { %v2867_v44 = vpop.eup %2866 }
 0x492   : > { %v1234_v45 = vsel %vm1179_vm7, %v2867_v44, 0.0 }
 0x493   : > { %1235 = vadd.xlane.f32.xlu1 %v1234_v45 }
 0x495   : > { %v2869_v46 = vpop.eup %2868 }
 0x496   : > { %v2871_v47 = vpop.eup %2870  ;;  %v1240_v48 = vsel %vm1179_vm7, %v2869_v46, 0.0 }
 0x497   : > { %1241 = vadd.xlane.f32.xlu1 %v1240_v48  ;;  %v1237_v49 = vsel %vm1179_vm7, %v2871_v47, 0.0 }
 0x498   : > { %1238 = vadd.xlane.f32.xlu0 %v1237_v49 }
 0x499   : > { %v2873_v50 = vpop.eup %2872 }
 0x49a   : > { %v2875_v51 = vpop.eup %2874  ;;  %v1243_v52 = vsel %vm1179_vm7, %v2873_v50, 0.0 }
 0x49b   : > { %v1246_v53 = vsel %vm1179_vm7, %v2875_v51, 0.0 }
 0x49c   : > { %1247 = vadd.xlane.f32.xlu1 %v1246_v53  ;;  %1244 = vadd.xlane.f32.xlu0 %v1243_v52 }
 0x49d   : > { %v2877_v54 = vpop.eup %2876 }
 0x49e   : > { %v1249_v55 = vsel %vm1179_vm7, %v2877_v54, 0.0 }
 0x4a0   : > { %1250 = vadd.xlane.f32.xlu0 %v1249_v55 }
 0x4ad   : > { %1276 = vrot.lane.b32.xlu1 %v3288_v35, %s3004_s24 }
 0x4b6   : > { %1278 = vrot.lane.b32.xlu0 %v3286_v34, %s3004_s24 }
 0x4cf   : > { %v1230_v58 = vpop.xlane.xlu1 %1229 }
 0x4d0   : > { %1284 = vxpose.xlu1.c.b16.start.end [1/1] (short) (narrow) %v1273_v56, 16  ;;  %2878 = vrcp.f32 %v1230_v58  ;;  %v1665_v56 = vlaneseq  ;;  %v3006_v58 = vmov 1934713408  }
 0x4d3   : > { %v1233_v59 = vpop.xlane.xlu0 %1232 }
 0x4d4   : > { %1300 = vxpose.xlu0.c.b16.start.end [1/1] (short) (narrow) %v1275_v57, 16  ;;  %2880 = vrcp.f32 %v1233_v59  ;;  %v1695_v59 = vunpack.c.l.s4 %v3006_v58 }
 0x4dd   : > { %v2879_v60 = vpop.eup %2878 }
 0x4de   : > { %v1260_v62 = vmul.f32 %v2879_v60, %v2863_v18 }
 0x4e1   : > { %v2881_v61 = vpop.eup %2880 }
 0x4e2   : > { %v1261_v63 = vmul.f32 %v2881_v61, %v2865_v22  ;;  %v1666_v61 = vshrl.u32 %v1665_v56, 7 }
 0x4e4   : > { %v1268_v0 = vpack.c.bf16 %v1261_v63, %v1260_v62  ;;  %v1696_v63 = vunpack.c.0.s8 %v1695_v59 }
 0x4e6   : > { %v1352_v1 = vsel %vm1179_vm7, %v1268_v0, 0 }
 0x4e7   : > { %2683 = vmatpush3.bf16.xpose.msra.mxu0 %v1352_v1 }
 0x4e8   : > { %2694 = vmatprep.subr.bf16.mxu0 %v2998_v17 }
 0x51c   : > { %v1236_v35 = vpop.xlane.xlu1 %1235 }
 0x51d   : > { %2882 = vrcp.f32 %v1236_v35 }
 0x520   : > { %v1242_v34 = vpop.xlane.xlu1 %1241 }
 0x521   : > { %v1239_v2 = vpop.xlane.xlu0 %1238 }
 0x522   : > { %2884 = vrcp.f32 %v1239_v2 }
 0x523   : > { %2886 = vrcp.f32 %v1242_v34 }
 0x525   : > { %v1248_v3 = vpop.xlane.xlu1 %1247  ;;  %v1245_v4 = vpop.xlane.xlu0 %1244 }
 0x526   : > { %2888 = vrcp.f32 %v1245_v4 }
 0x527   : > { %2890 = vrcp.f32 %v1248_v3 }
 0x529   : > { %v1277_v5 = vpop.permute.xlu1 %1276  ;;  %v1251_v6 = vpop.xlane.xlu0 %1250 }
 0x52a   : > { %2892 = vrcp.f32 %v1251_v6  ;;  %1316 = vxpose.xlu1.c.b16.start.end [1/1] (short) (narrow) %v1277_v5, 16  ;;  %v2883_v7 = vpop.eup %2882  ;;  %v3356_v5 = vsub.s32 %v1696_v63, %v1666_v61 }
 0x52b   : > { %v1262_v10 = vmul.f32 %v2883_v7, %v2867_v44 }
 0x52d   : > { %v1279_v8 = vpop.permute.xlu0 %1278 }
 0x52e   : > { %1332 = vxpose.xlu0.c.b16.start.end [1/1] (short) (narrow) %v1279_v8, 16 }
 0x52f   : > { %v2885_v9 = vpop.eup %2884 }
 0x530   : > { %v1263_v11 = vmul.f32 %v2885_v9, %v2871_v47  ;;  %v2887_v12 = vpop.eup %2886 }
 0x531   : > { %v1264_v21 = vmul.f32 %v2887_v12, %v2869_v46 }
 0x532   : > { %v1269_v13 = vpack.c.bf16 %v1263_v11, %v1262_v10  ;;  %v1292_v14 = vpop.trf.xlu1 }
 0x533   : > { %2685 = vmatmul.mubr.msk.bf16.vlgmr.msra.gmra.mxu0 %vm1179_vm7, %v1292_v14  ;;  %v2889_v15 = vpop.eup %2888 }
 0x534   : > { %v1398_v16 = vsel %vm1179_vm7, %v1269_v13, 0  ;;  %2696 = vmatprep.mubr.msk.bf16.mxu0 %vm2999_vm3, %v2998_v17  ;;  %v2891_v18 = vpop.eup %2890  ;;  %v1265_v22 = vmul.f32 %v2889_v15, %v2873_v50 }
 0x535   : > { %2689 = vmatpush3.bf16.xpose.msra.mxu1 %v1398_v16  ;;  %v1266_v25 = vmul.f32 %v2891_v18, %v2875_v51 }
 0x536   : > { %2700 = vmatprep.subr.bf16.mxu1 %v2998_v17  ;;  %v1270_v24 = vpack.c.bf16 %v1265_v22, %v1264_v21  ;;  %v1308_v28 = vpop.trf.xlu0 }
 0x537   : > { %v2893_v23 = vpop.eup %2892 }
 0x538   : > { %v1267_v26 = vmul.f32 %v2893_v23, %v2877_v54  ;;  %v1444_v27 = vsel %vm1179_vm7, %v1270_v24, 0  ;;  %v3005_v54 = vmov 1983009808  }
 0x539   : > { %2695 = vmatpush3.bf16.xpose.msra.mxu0 %v1444_v27  ;;  %v1663_v55 = vunpack.c.l.s4 %v3005_v54 }
 0x53a   : > { %v1271_v29 = vpack.c.bf16 %v1267_v26, %v1266_v25  ;;  %2706 = vmatprep.subr.bf16.mxu0 %v2998_v17 }
 0x53b   : > { %v1664_v60 = vunpack.c.0.s8 %v1663_v55 }
 0x53c   : > { %2691 = vmatmul.mubr.msk.bf16.vlgmr.msra.gmra.mxu1 %vm1179_vm7, %v1308_v28  ;;  %v1490_v30 = vsel %vm1179_vm7, %v1271_v29, 0 }
 0x53d   : > { %2701 = vmatpush3.bf16.xpose.msra.mxu1 %v1490_v30  ;;  %2702 = vmatprep.mubr.msk.bf16.mxu1 %vm2999_vm3, %v2998_v17  ;;  %v1667_v0 = vsub.s32 %v1664_v60, %v1666_v61 }
 0x53e   : > { %2714 = vmatprep.subr.bf16.mxu1 %v2998_v17 }
 0x58c   : > { %v1324_v31 = vpop.trf.xlu1 }
 0x58d   : > { %2697 = vmatmul.mubr.msk.bf16.vlgmr.msra.gmra.mxu0 %vm1179_vm7, %v1324_v31 }
 0x58e   : > { %2710 = vmatprep.mubr.msk.bf16.mxu0 %vm2999_vm3, %v2998_v17 }
 0x590   : > { %v1340_v32 = vpop.trf.xlu0 }
 0x591   : > { %2703 = vmatmul.mubr.msk.bf16.vlgmr.msra.gmra.mxu1 %vm1179_vm7, %v1340_v32 }
 0x592   : > { %2718 = vmatprep.mubr.msk.bf16.mxu1 %vm2999_vm3, %v2998_v17 }
 0x5f3   : > { %v1388_v33 = vpop.f32.mrf.mxu0 }
 0x5f4   : > { %1532 = vxpose.xlu1.b32.start.end [1/1] (short) (narrow) %v1388_v33, 16 }
 0x5f5   : > { %v2686_v36 = vpop.f32.mrf.mxu0 }
 0x5f7   : > { %v1391_v37 = vpop.f32.mrf.mxu0 }
 0x5f9   : > { %v2687_v38 = vpop.f32.mrf.mxu0 }
 0x5fc   : > { %v1434_v39 = vpop.f32.mrf.mxu1 }
 0x5fd   : > { %1564 = vxpose.xlu0.b32.start.end [1/1] (short) (narrow) %v1434_v39, 16 }
 0x5fe   : > { %v2692_v40 = vpop.f32.mrf.mxu1 }
 0x600   : > { %v1437_v41 = vpop.f32.mrf.mxu1 }
 0x602   : > { %v2693_v42 = vpop.f32.mrf.mxu1 }
 0x64d   : > { %v1480_v43 = vpop.f32.mrf.mxu0 }
 0x64e   : > { %1596 = vxpose.xlu0.b32.start.end [1/1] (short) (narrow) %v1480_v43, 16 }
 0x64f   : > { %v2698_v44 = vpop.f32.mrf.mxu0 }
 0x651   : > { %v1526_v45 = vpop.f32.mrf.mxu1  ;;  %v1483_v46 = vpop.f32.mrf.mxu0 }
 0x652   : > { %1628 = vxpose.xlu1.b32.start.end [1/1] (short) (narrow) %v1526_v45, 16 }
 0x653   : > { %v2704_v47 = vpop.f32.mrf.mxu1  ;;  %v2699_v48 = vpop.f32.mrf.mxu0 }
 0x655   : > { %v1529_v49 = vpop.f32.mrf.mxu1 }
 0x657   : > { %v2705_v50 = vpop.f32.mrf.mxu1 }
 0x670   : > { %v1548_v52 = vpop.trf.xlu1 }
 0x674   : > { %v1549_v57 = vpop.trf.xlu1 }
 0x679   : > { %v1580_v51 = vpop.trf.xlu0 }
 0x67d   : > { %v1581_v53 = vpop.trf.xlu0 }
 0x6ca   : > { %v1612_v62 = vpop.trf.xlu0 }
 0x6cb   : > { %v1660_v1 = vcombine.low %v1548_v52, %v1612_v62  ;;  %v1661_v35 = vcombine.high %v1548_v52, %v1612_v62  ;;  %v2850_v52 = vld [vmem:[%s3191_s1 + $0x8] sm:$0xff]  }
 0x6cc   : > { %2707 = vmatpush3.bf16.msra.mxu0 %v2850_v52 }
 0x6cd   : > { %v1668_v6 = vrot.slane %v1660_v1, %v1667_v0  ;;  %v1675_v7 = vrot.slane %v1661_v35, %v1667_v0  ;;  %2708 = vmatprep.subr.bf16.mxu0 %v2998_v17 }
 0x6ce   : > { %v1644_v34 = vpop.trf.xlu1  ;;  %v1613_v4 = vpop.trf.xlu0 }
 0x6cf   : > { %v1676_v2 = vcombine.low %v1580_v51, %v1644_v34  ;;  %v1677_v3 = vcombine.high %v1580_v51, %v1644_v34  ;;  %v1728_v10 = vcombine.low %v1549_v57, %v1613_v4  ;;  %v1729_v11 = vcombine.high %v1549_v57, %v1613_v4  ;;  %v2851_v34 = vld [vmem:[%s3191_s1] sm:$0xff]   ;;  %s3007_s1 = smov 16  }
 0x6d0   : > { %2709 = vmatpush3.bf16.msra.mxu0 %v2851_v34 }
 0x6d1   : > { %v1684_v8 = vrot.slane %v1676_v2, %v1667_v0  ;;  %v1691_v9 = vrot.slane %v1677_v3, %v1667_v0  ;;  %v1736_v26 = vrot.slane %v1728_v10, %v1667_v0  ;;  %v1743_v27 = vrot.slane %v1729_v11, %v1667_v0  ;;  %2722 = vmatprep.subr.bf16.mxu0 %v2998_v17 }
 0x6d2   : > { %v1645_v12 = vpop.trf.xlu1 }
 0x6d3   : > { %v1692_v13 = vcombine.low %v1668_v6, %v1684_v8  ;;  %v1693_v14 = vcombine.high %v1668_v6, %v1684_v8  ;;  %v1708_v15 = vcombine.low %v1675_v7, %v1691_v9  ;;  %v1709_v16 = vcombine.high %v1675_v7, %v1691_v9 }
 0x6d4   : > { %v1744_v18 = vcombine.low %v1581_v53, %v1645_v12  ;;  %v1745_v21 = vcombine.high %v1581_v53, %v1645_v12 }
 0x6d5   : > { %v1700_v22 = vrot.slane %v1692_v13, %v3356_v5  ;;  %v1707_v23 = vrot.slane %v1693_v14, %v3356_v5  ;;  %v1716_v24 = vrot.slane %v1708_v15, %v3356_v5  ;;  %v1723_v25 = vrot.slane %v1709_v16, %v3356_v5 }
 0x6d6   : > { %v1752_v28 = vrot.slane %v1744_v18, %v1667_v0  ;;  %v1759_v29 = vrot.slane %v1745_v21, %v1667_v0 }
 0x6d7   : > { %v1796_v30 = vcombine.low %v1700_v22, %v1707_v23  ;;  %v2561_v31 = vcombine.high %v1700_v22, %v1707_v23  ;;  %v1812_v32 = vcombine.low %v1716_v24, %v1723_v25  ;;  %v2562_v33 = vcombine.high %v1716_v24, %v1723_v25 }
 0x6d8   : > { %v1760_v36 = vcombine.low %v1736_v26, %v1752_v28  ;;  %v1761_v37 = vcombine.high %v1736_v26, %v1752_v28  ;;  %v1776_v38 = vcombine.low %v1743_v27, %v1759_v29  ;;  %v1777_v39 = vcombine.high %v1743_v27, %v1759_v29 }
 0x6d9   : > { %v1803_v40 = vrot.slane %v1796_v30, %v1667_v0  ;;  %v1811_v41 = vrot.slane %v2561_v31, %v1667_v0  ;;  %v1819_v42 = vrot.slane %v1812_v32, %v1667_v0  ;;  %v1827_v43 = vrot.slane %v2562_v33, %v1667_v0 }
 0x6da   : > { %v1768_v44 = vrot.slane %v1760_v36, %v3356_v5  ;;  %v1775_v45 = vrot.slane %v1761_v37, %v3356_v5  ;;  %v1784_v46 = vrot.slane %v1776_v38, %v3356_v5  ;;  %v1791_v47 = vrot.slane %v1777_v39, %v3356_v5 }
 0x6db   : > { %v1829_v48 = vcombine.high %v1803_v40, %v1811_v41  ;;  %v1845_v49 = vcombine.high %v1819_v42, %v1827_v43  ;;  %v1828_v50 = vcombine.low %v1803_v40, %v1811_v41  ;;  %v1844_v51 = vcombine.low %v1819_v42, %v1827_v43  ;;  %v2565_v40 = vld [vmem:[%s3586_s20] ss:$0 sm:$0xff] }
 0x6dc   : > { %v1864_v53 = vcombine.low %v1768_v44, %v1775_v45  ;;  %v2563_v54 = vcombine.high %v1768_v44, %v1775_v45  ;;  %v1880_v55 = vcombine.low %v1784_v46, %v1791_v47  ;;  %v2564_v56 = vcombine.high %v1784_v46, %v1791_v47 }
 0x6dd   : > { %v1836_v57 = vrot.slane %v1828_v50, %v3356_v5  ;;  %v1852_v58 = vrot.slane %v1844_v51, %v3356_v5  ;;  %v1843_v63 = vrot.slane %v1829_v48, %v3356_v5  ;;  %v1859_v1 = vrot.slane %v1845_v49, %v3356_v5 }
 0x6de   : > { %v1871_v59 = vrot.slane %v1864_v53, %v1667_v0  ;;  %v1879_v60 = vrot.slane %v2563_v54, %v1667_v0  ;;  %v1887_v61 = vrot.slane %v1880_v55, %v1667_v0  ;;  %v1895_v62 = vrot.slane %v2564_v56, %v1667_v0 }
 0x6df   : > { %v1860_v35 = vcombine.low %v1836_v57, %v1852_v58  ;;  %v1862_v10 = vcombine.low %v1843_v63, %v1859_v1  ;;  %v1861_v12 = vcombine.high %v1836_v57, %v1852_v58  ;;  %v1863_v21 = vcombine.high %v1843_v63, %v1859_v1  ;;  %v2856_v63 = vld [vmem:[%s3222_s29 + $0x28] sm:$0xff]   ;;  %v2857_v1 = vld [vmem:[%s3222_s29 + $0x20] sm:$0xff]  }
 0x6e0   : > { %v1897_v2 = vcombine.high %v1871_v59, %v1879_v60  ;;  %v1913_v3 = vcombine.high %v1887_v61, %v1895_v62  ;;  %v1896_v4 = vcombine.low %v1871_v59, %v1879_v60  ;;  %v1912_v6 = vcombine.low %v1887_v61, %v1895_v62  ;;  %v2852_v59 = vld [vmem:[%s3208_s18 + $0x8] sm:$0xff]   ;;  %v2853_v60 = vld [vmem:[%s3208_s18] sm:$0xff]   ;;  %v2854_v61 = vld [vmem:[%s3222_s29 + $0x38] sm:$0xff]  }
 0x6e1   : > { %2715 = vmatpush3.bf16.msra.mxu1 %v2852_v59  ;;  %v2855_v62 = vld [vmem:[%s3222_s29 + $0x30] sm:$0xff]  }
 0x6e2   : > { %v1911_v7 = vrot.slane %v1897_v2, %v3356_v5  ;;  %v1927_v8 = vrot.slane %v1913_v3, %v3356_v5  ;;  %v1904_v9 = vrot.slane %v1896_v4, %v3356_v5  ;;  %v1920_v0 = vrot.slane %v1912_v6, %v3356_v5  ;;  %2716 = vmatprep.subr.bf16.mxu1 %v2998_v17 }
 0x6e4   : > { %v1930_v11 = vcombine.low %v1911_v7, %v1927_v8  ;;  %v1929_v13 = vcombine.high %v1904_v9, %v1920_v0  ;;  %v1928_v14 = vcombine.low %v1904_v9, %v1920_v0  ;;  %v1931_v18 = vcombine.high %v1911_v7, %v1927_v8  ;;  %v2569_v0 = vld [vmem:[%s3587_s28] ss:$0 sm:$0xff] }
 0x6e5   : > { %2717 = vmatpush3.bf16.msra.mxu1 %v2853_v60  ;;  %v2584_v60 = vld [vmem:[%s720_s16] ss:$0 sm:$0xff] }
 0x6e6   : > { %v2838_v15 = vpack.i.bf16 %v1930_v11, %v1862_v10  ;;  %v2833_v16 = vpack.i.bf16 %v1929_v13, %v1861_v12  ;;  %v2843_v22 = vpack.i.bf16 %v1931_v18, %v1863_v21  ;;  %v2570_v13 = vld [vmem:[%s3588_s3] ss:$0 sm:$0xff]  ;;  %v2859_v21 = vld [vmem:[%s3222_s29 + $0x10] sm:$0xff]  }
 0x6e8   : > { %2839 = vrot.lane.b32.xlu1 %v2838_v15, %s3007_s1  ;;  %2834 = vrot.lane.b32.xlu0 %v2833_v16, %s3008_s21 }
 0x6ec   : > { %2844 = vrot.lane.b32.xlu1 %v2843_v22, %s3009_s27  ;;  %v2860_v22 = vld [vmem:[%s3222_s29 + $0x8] sm:$0xff]  }
 0x75a   : > { %v2840_v23 = vpop.permute.xlu1 %2839  ;;  %v2835_v5 = vpop.permute.xlu0 %2834 }
 0x75b   : > { %v2837_v24 = vunpack.i.h.bf16 %v2835_v5  ;;  %v2836_v25 = vunpack.i.l.bf16 %v2835_v5  ;;  %v2842_v26 = vunpack.i.h.bf16 %v2840_v23  ;;  %v2841_v27 = vunpack.i.l.bf16 %v2840_v23  ;;  %v2861_v23 = vld [vmem:[%s3222_s29] sm:$0xff]  }
 0x75c   : > { %v2571_v5 = vld [vmem:[%s709_s25] ss:$0 sm:$0xff] }
 0x75d   : > { %v1956_v28 = vsel %vm989_vm6, %v1860_v35, %v2836_v25  ;;  %v1957_v29 = vsel %vm989_vm6, %v1928_v14, %v2837_v24  ;;  %v2858_v35 = vld [vmem:[%s3222_s29 + $0x18] sm:$0xff]   ;;  %s3589_s29 = scalar_lea.vmem %s3531_s13, %s3173_s19 }
 0x75e   : > { %v2845_v30 = vpop.permute.xlu1 %2844  ;;  %v1958_v33 = vsel %vm1179_vm7, %v1956_v28, %v2841_v27  ;;  %v1959_v36 = vsel %vm1179_vm7, %v1957_v29, %v2842_v26 }
 0x75f   : > { %v2847_v31 = vunpack.i.h.bf16 %v2845_v30  ;;  %v2846_v32 = vunpack.i.l.bf16 %v2845_v30 }
 0x761   : > { %v1961_v37 = vsel %vm1960_vm8, %v1958_v33, %v2846_v32  ;;  %v1962_v38 = vsel %vm1960_vm8, %v1959_v36, %v2847_v31 }
 0x762   : > { %v1963_v39 = vpack.c.bf16 %v1962_v38, %v1961_v37 }
 0x764   : > { %2711 = vmatmul.mubr.msk.bf16.vlgmr.msra.gmra.mxu0 %vm850_vm4, %v1963_v39 }
 0x765   : > { %2738 = vmatprep.mubr.msk.bf16.mxu0 %vm2999_vm3, %v2998_v17  ;;  %2723 = vmatpush3.bf16.msra.mxu0 %v2854_v61 }
 0x766   : > { %2724 = vmatprep.subr.bf16.mxu0 %v2998_v17 }
 0x769   : > { %2725 = vmatpush3.bf16.msra.mxu0 %v2855_v62  ;;  %v2585_v62 = vld [vmem:[%s723_s4] ss:$0 sm:$0xff] }
 0x76a   : > { %2726 = vmatprep.subr.bf16.mxu0 %v2998_v17 }
 0x76d   : > { %2727 = vmatpush3.bf16.msra.mxu0 %v2856_v63 }
 0x76e   : > { %2728 = vmatprep.subr.bf16.mxu0 %v2998_v17 }
 0x771   : > { %2729 = vmatpush3.bf16.msra.mxu0 %v2857_v1 }
 0x772   : > { %2730 = vmatprep.subr.bf16.mxu0 %v2998_v17 }
 0x775   : > { %2731 = vmatpush3.bf16.msra.mxu0 %v2858_v35 }
 0x776   : > { %2732 = vmatprep.subr.bf16.mxu0 %v2998_v17 }
 0x779   : > { %2733 = vmatpush3.bf16.msra.mxu0 %v2859_v21 }
 0x77a   : > { %2734 = vmatprep.subr.bf16.mxu0 %v2998_v17 }
 0x77d   : > { %2735 = vmatpush3.bf16.msra.mxu0 %v2860_v22 }
 0x77e   : > { %2736 = vmatprep.subr.bf16.mxu0 %v2998_v17  ;;  %v2575_v17 = vld [vmem:[%s3589_s29] ss:$0 sm:$0xff] }
 0x781   : > { %2737 = vmatpush3.bf16.msra.mxu0 %v2861_v23 }
 0x824   : > { %v2019_v41 = vpop.f32.mrf.mxu0 }
 0x825   : > { %v2020_v42 = vadd.f32 %v2565_v40, %v2019_v41 }
 0x826   : > { %v2712_v43 = vpop.f32.mrf.mxu0 }
 0x827   : > { %v2026_v44 = vadd.f32 %v2020_v42, %v3259_v19 }
 0x828   : > { %v2022_v45 = vpop.f32.mrf.mxu0 }
 0x829   : > { %v2023_v46 = vadd.f32 %v2565_v40, %v2022_v45  ;;  %v2030_v47 = vsel %vm850_vm4, %v2026_v44, 0.0 }
 0x82a   : > { %2031 = vadd.xlane.f32.xlu1 %v2030_v47  ;;  %v2713_v48 = vpop.f32.mrf.mxu0 }
 0x82b   : > { %v2027_v49 = vadd.f32 %v2023_v46, %v3261_v20 }
 0x82d   : > { %v2033_v50 = vsel %vm850_vm4, %v2027_v49, 0.0 }
 0x82e   : > { %2034 = vadd.xlane.f32.xlu0 %v2033_v50 }
 0x8b3   : > { %v2032_v51 = vpop.xlane.xlu1 %2031 }
 0x8b4   : > { %v2037_v52 = vmul.f32 0.03125, %v2032_v51 }
 0x8b6   : > { %v2039_v53 = vsub.f32 %v2026_v44, %v2037_v52 }
 0x8b7   : > { %v2035_v54 = vpop.xlane.xlu0 %2034 }
 0x8b8   : > { %v2038_v19 = vmul.f32 0.03125, %v2035_v54  ;;  %v2041_v55 = vmul.f32 %v2039_v53, %v2039_v53 }
 0x8ba   : > { %v2040_v56 = vsub.f32 %v2027_v49, %v2038_v19  ;;  %v2043_v57 = vsel %vm850_vm4, %v2041_v55, 0.0 }
 0x8bb   : > { %2044 = vadd.xlane.f32.xlu0 %v2043_v57 }
 0x8bc   : > { %v2042_v58 = vmul.f32 %v2040_v56, %v2040_v56 }
 0x8be   : > { %v2046_v20 = vsel %vm850_vm4, %v2042_v58, 0.0 }
 0x8bf   : > { %2047 = vadd.xlane.f32.xlu1 %v2046_v20 }
 0x944   : > { %v2045_v34 = vpop.xlane.xlu0 %2044 }
 0x945   : > { %v2049_v2 = vmul.f32 0.03125, %v2045_v34 }
 0x947   : > { %v2051_v3 = vadd.f32 1e-05, %v2049_v2 }
 0x948   : > { %v2048_v4 = vpop.xlane.xlu1 %2047 }
 0x949   : > { %2894 = vrsqrt.f32 %v2051_v3  ;;  %v2050_v6 = vmul.f32 0.03125, %v2048_v4 }
 0x94b   : > { %v2052_v7 = vadd.f32 1e-05, %v2050_v6 }
 0x94d   : > { %2896 = vrsqrt.f32 %v2052_v7 }
 0x956   : > { %v2895_v8 = vpop.eup %2894 }
 0x957   : > { %v2055_v9 = vmul.f32 %v2895_v8, %v2039_v53 }
 0x959   : > { %v2063_v12 = vmul.f32 %v2569_v0, %v2055_v9 }
 0x95a   : > { %v2897_v10 = vpop.eup %2896 }
 0x95b   : > { %v2056_v11 = vmul.f32 %v2897_v10, %v2040_v56  ;;  %v2071_v15 = vadd.f32 %v2570_v13, %v2063_v12 }
 0x95d   : > { %v2064_v14 = vmul.f32 %v2569_v0, %v2056_v11 }
 0x95f   : > { %v2072_v16 = vadd.f32 %v2570_v13, %v2064_v14 }
 0x961   : > { %v2095_v18 = vpack.c.bf16 %v2072_v16, %v2071_v15 }
 0x963   : > { %2719 = vmatmul.mubr.msk.bf16.vlgmr.msra.gmra.mxu1 %vm850_vm4, %v2095_v18 }
 0xa23   : > { %v2151_v24 = vpop.f32.mrf.mxu1 }
 0xa24   : > { %v2152_v26 = vadd.f32 %v2571_v5, %v2151_v24 }
 0xa25   : > { %v2720_v25 = vpop.f32.mrf.mxu1 }
 0xa26   : > { %v2158_v30 = vmax.f32 %v2152_v26, 0.0 }
 0xa27   : > { %v2154_v27 = vpop.f32.mrf.mxu1 }
 0xa28   : > { %v2155_v28 = vadd.f32 %v2571_v5, %v2154_v27 }
 0xa29   : > { %v2721_v29 = vpop.f32.mrf.mxu1 }
 0xa2a   : > { %v2159_v31 = vmax.f32 %v2155_v28, 0.0 }
 0xa2c   : > { %v2160_v32 = vpack.c.bf16 %v2159_v31, %v2158_v30 }
 0xa2e   : > { %2739 = vmatmul.mubr.bf16.vlgmr.msra.gmra.mxu0 %v2160_v32 }
 0xaee   : > { %v2249_v33 = vpop.f32.mrf.mxu0 }
 0xaef   : > { %v2250_v36 = vadd.f32 %v2575_v17, %v2249_v33 }
 0xaf0   : > { %v2740_v37 = vpop.f32.mrf.mxu0 }
 0xaf1   : > { %v2256_v38 = vadd.f32 %v2250_v36, %v2071_v15 }
 0xaf2   : > { %v2252_v39 = vpop.f32.mrf.mxu0 }
 0xaf3   : > { %v2253_v40 = vadd.f32 %v2575_v17, %v2252_v39  ;;  %v2260_v41 = vsel %vm850_vm4, %v2256_v38, 0.0 }
 0xaf4   : > { %2261 = vadd.xlane.f32.xlu0 %v2260_v41  ;;  %v2741_v42 = vpop.f32.mrf.mxu0 }
 0xaf5   : > { %v2257_v43 = vadd.f32 %v2253_v40, %v2072_v16 }
 0xaf7   : > { %v2263_v44 = vsel %vm850_vm4, %v2257_v43, 0.0 }
 0xaf8   : > { %2264 = vadd.xlane.f32.xlu1 %v2263_v44 }
 0xb7d   : > { %v2262_v45 = vpop.xlane.xlu0 %2261 }
 0xb7e   : > { %v2266_v46 = vmul.f32 0.03125, %v2262_v45 }
 0xb80   : > { %v2268_v47 = vsub.f32 %v2256_v38, %v2266_v46 }
 0xb81   : > { %v2265_v48 = vpop.xlane.xlu1 %2264 }
 0xb82   : > { %v2267_v49 = vmul.f32 0.03125, %v2265_v48  ;;  %v2270_v50 = vmul.f32 %v2268_v47, %v2268_v47 }
 0xb84   : > { %v2269_v51 = vsub.f32 %v2257_v43, %v2267_v49  ;;  %v2272_v52 = vsel %vm850_vm4, %v2270_v50, 0.0 }
 0xb85   : > { %2273 = vadd.xlane.f32.xlu0 %v2272_v52 }
 0xb86   : > { %v2271_v53 = vmul.f32 %v2269_v51, %v2269_v51 }
 0xb88   : > { %v2275_v54 = vsel %vm850_vm4, %v2271_v53, 0.0 }
 0xb89   : > { %2276 = vadd.xlane.f32.xlu1 %v2275_v54 }
 0xc0e   : > { %v2274_v19 = vpop.xlane.xlu0 %2273 }
 0xc0f   : > { %v2278_v55 = vmul.f32 0.03125, %v2274_v19 }
 0xc11   : > { %v2280_v56 = vadd.f32 1e-05, %v2278_v55 }
 0xc12   : > { %v2277_v57 = vpop.xlane.xlu1 %2276 }
 0xc13   : > { %2898 = vrsqrt.f32 %v2280_v56  ;;  %v2279_v58 = vmul.f32 0.03125, %v2277_v57 }
 0xc15   : > { %v2281_v20 = vadd.f32 1e-05, %v2279_v58 }
 0xc17   : > { %2900 = vrsqrt.f32 %v2281_v20 }
 0xc20   : > { %v2899_v59 = vpop.eup %2898 }
 0xc21   : > { %v2284_v61 = vmul.f32 %v2899_v59, %v2268_v47 }
 0xc23   : > { %v2292_v63 = vmul.f32 %v2584_v60, %v2284_v61 }
 0xc24   : > { %v2901_v1 = vpop.eup %2900 }
 0xc25   : > { %v2300_v35 = vadd.f32 %v2585_v62, %v2292_v63  ;;  %v2285_v34 = vmul.f32 %v2901_v1, %v2269_v51 }
 0xc27   : > { %2302 = vst.msk [vmem:[#allocation2] sm:$0xff] %vm850_vm4, %v2300_v35  ;;  %v2293_v2 = vmul.f32 %v2584_v60, %v2285_v34  ;;  %2307 = sbr.rel (%p2586_p1) target bundleno = 3119 (0xc2f), region = 92 }
 0xc29   : > { %v2301_v3 = vadd.f32 %v2585_v62, %v2293_v2 }
 0xc2b   : > { %2303 = vst.msk [vmem:[#allocation2 + $0x8] sm:$0xff] %vm850_vm4, %v2301_v3 }
 0xc2c   : > { %v2599_v4 = vpack.c.bf16 %v2300_v35, %v2300_v35  ;;  %vm2316_vm9 = vcmask 257024   ;;  %v2600_v6 = vpack.c.bf16 %v2301_v3, %v2301_v3 }
 0xc2e   : > { %2317 = vst.msk [vmem:[%s3232_s2] sm:$0xf] %vm2316_vm9, %v2599_v4  ;;  %2318 = vst.msk [vmem:[%s3232_s2 + $0x4] sm:$0xf] %vm2316_vm9, %v2600_v6 }
 0xc2f PF: > { %s3591_s4 = sld [smem:[#allocation10_spill]]  ;;  %s2333_s21 = sshll.u32 %s3232_s2, 4  ;;  %s3461_s21 = int_to_ptr.vmem [resolvable:$true] %s2333_s21 }
 0xc30   : > { %s3592_s19 = sld [smem:[#allocation7_spill]]  ;;  %s2902_s29 = scalar_lea.vmem %s3461_s21, 128 }
 0xc31   : > { %s3594_s3 = sld [smem:[#allocation26_spill]]  ;;  %p2903_p2 = scmp.ne.s32.totalorder %s3461_s21, %s2902_s29 }
 0xc32   : > { %s3010_s25 = smov [#allocation3]  }
 0xc33   : > { %p2904_p4 = pnand %p2903_p2, %p3146_p3  ;;  %s2906_s26 = sshll.u32 %s3010_s25, 4  ;;  %s2907_s26 = int_to_ptr.vmem [resolvable:$false] %s2906_s26 }
 0xc34   : > { %s2908_s20 = scalar_lea.vmem %s2907_s26, 256  ;;  %p2909_p6 = scmp.lt.s32.totalorder %s3461_s21, %s2907_s26 }
 0xc35   : > { %s2601_s28 = sshll.u32 %s3591_s4, 7  ;;  %p2905_p5 = pneg %p2904_p4 }
 0xc36   : > { %s3595_s27 = sand.u32 1, %s3592_s19   ;;  %p2910_p7 = scmp.lt.s32.totalorder %s2908_s20, %s2902_s29 }
 0xc37   : > { %s3458_s1 = scalar_lea.hbm %s3594_s3, %s2601_s28  ;;  %s3465_s0 = scalar_lea.sflag [#allocation4], %s3595_s27 }
 0xc38   : > { %p2911_p8 = por %p2910_p7, %p2909_p6 }
 0xc3a   : > { %p2912_p10 = pnand %p2911_p8, %p2905_p5 }
 0xc3c   : > { %2915 = shalt.err (!%p2912_p10)
}
 0xc3d   : > { %s2916_s2 = scalar_lea.hbm %s3458_s1, 128  ;;  %s2920_s4 = scalar_lea.hbm %s3594_s3, 256 }
 0xc3e   : > { %p2917_p11 = scmp.ne.s32.totalorder %s3458_s1, %s2916_s2  ;;  %p2921_p0 = scmp.lt.s32.totalorder %s3458_s1, %s3594_s3 }
 0xc3f   : > { %p2922_p1 = scmp.lt.s32.totalorder %s2920_s4, %s2916_s2 }
 0xc40   : > { %p2918_p12 = pnand %p2917_p11, %p3146_p3 }
 0xc41   : > { %p2923_p2 = por %p2922_p1, %p2921_p0 }
 0xc42   : > { %p2919_p13 = pneg %p2918_p12 }
 0xc44   : > { %p2924_p4 = pnand %p2923_p2, %p2919_p13 }
 0xc46   : > { %2927 = shalt.err (!%p2924_p4)
}
 0xc47   : > { %s3011_s30 = smov 4  }
 0xc48   : > { %2742 = dma.vmem_to_hbm [thread:$0]  (%p3146_p3), %s3461_s21, 128, %s3458_s1, %s3465_s0, %s3004_s24, %s3004_s24, %s3011_s30  }
 0xc49 PF: > { %s3596_s22 = sld [smem:[#allocation13_spill]] }
 0xc4a   : > { %s3597_s27 = sld [smem:[#allocation6_spill]] }
 0xc4f   : > { %p2748_p5 = scmp.ge.s32.totalorder %s3596_s22, 2 }
 0xc50   : > { %s2348_s25 = sand.u32 1, %s3597_s27  }
 0xc51   : > { %p2745_p6 = pnand %p2748_p5, %p3156_p9  ;;  %s2349_s26 = scalar_lea.sflag [#allocation4], %s2348_s25 }
 0xc53   : > { %p2746_p7 = pneg %p2745_p6 }
 0xc55   : > { %2961 = dma.done.wait (%p2746_p7), %s2349_s26, 128  }
 0xc56   : > { %2963 = vsyncadd (%p2746_p7), %s2349_s26, 4294967168  ;;  %s29_s28 = sadd.s32 1, %s3596_s22   ;;  %s3599_s21 = sld [smem:[#allocation7_spill]] }
 0xc57   : > { %p26_p8 = scmp.ge.s32.totalorder %s29_s28, 6   ;;  %s3600_s22 = sld [smem:[#allocation8_spill]] }
 0xc58   : > { %s3601_s23 = sld [smem:[#allocation18_spill]] }
 0xc59   : > { %s3602_s24 = sld [smem:[#allocation11_spill]]  ;;  %28 = sbr.rel (!%p26_p8) target bundleno = 13 (0xd), region = 163 }
 0xc5a   : > { %s3603_s25 = sld [smem:[#allocation12_spill]] }
 0xc5b   : > { %s3604_s26 = sld [smem:[#allocation14_spill]] }
 0xc5c   : > { %s3605_s27 = sld [smem:[#allocation16_spill]] }
 0xc5e   :  { %2354 = vsyncpa [#allocation4], 1 }
 0xc5f   :  { %2356 = vsyncpa [#allocation4 + $0x1], 1 }

</bundles_post_ra>
